<compile_context>
chip_gen: v7x
topology: tpu7x:2x2x1
jax: 0.10.0
libtpu: 0.0.40
codegen_flags: <defaults>
</compile_context>

<pallas_src>
import functools

import jax
import jax.numpy as jnp
from jax.experimental import pallas as pl
from jax.experimental.pallas import tpu as pltpu


# ---------------------------------------------------------------------------
# Kernel 1: k-hop propagation (recurrence) + per-hop Linear + hop sum
#           + per-batch partial BatchNorm statistics
# ---------------------------------------------------------------------------
def gcn_kernel(a_ref, x_ref, w_ref, bsum_ref, y_ref, psum_ref, psumsq_ref, *, k):
    # a_ref:      (1, N, N)       f32    adjacency for this batch element
    # x_ref:      (1, N, Din)     f32    node features
    # w_ref:      (K, Din, Dout)  f32    Linear weights (pre-transposed)
    # bsum_ref:   (1, Dout)       f32    sum over hops of the Linear biases
    # y_ref:      (1, N, Dout)    f32    pre-BN activations (output)
    # psum_ref:   (1, 1, Dout)    f32    per-batch sum over nodes   (output)
    # psumsq_ref: (1, 1, Dout)    f32    per-batch sum of squares   (output)
    a = a_ref[0].astype(jnp.bfloat16)            # in-VMEM cast, VPU (free-ish)
    prop = x_ref[0].astype(jnp.bfloat16)         # (N, Din) bf16
    w = w_ref[...].astype(jnp.bfloat16)          # (K, Din, Dout) bf16
    n = a.shape[0]
    dout = w.shape[2]

    acc = jnp.zeros((n, dout), jnp.float32)
    for kk in range(k):                          # k is small & static -> unrolled
        # propagate: prop = A^{kk+1} @ X  (f32 accumulate, bf16 for next MXU pass)
        prop = jnp.dot(a, prop,
                       preferred_element_type=jnp.float32).astype(jnp.bfloat16)
        # per-hop Linear: contraction dim = Din = 128, MXU-native
        acc = acc + jnp.dot(prop, w[kk], preferred_element_type=jnp.float32)

    y = acc + bsum_ref[...]                      # bias added once (hoisted)
    y_ref[0] = y
    psum_ref[0] = jnp.sum(y, axis=0, keepdims=True)
    psumsq_ref[0] = jnp.sum(y * y, axis=0, keepdims=True)


# ---------------------------------------------------------------------------
# Kernel 2: apply precomputed BN scale/shift + leaky_relu, tiled over rows
# ---------------------------------------------------------------------------
def bn_lrelu_kernel(y_ref, scale_ref, shift_ref, o_ref):
    # y_ref: (1, TM, Dout) f32; scale/shift: (1, Dout) f32 (per-channel)
    z = y_ref[...] * scale_ref[...][None] + shift_ref[...][None]
    o_ref[...] = jnp.where(z >= 0, z, 0.01 * z)          # leaky_relu(0.01)


# ---------------------------------------------------------------------------
# Wrapper
# ---------------------------------------------------------------------------
@functools.partial(jax.jit, static_argnames=("k", "row_tile"))
def mpnn_mk_v2_forward(x, a, w, b, gamma, beta, *, k, row_tile=128):
    B, N, Din = x.shape
    K, _, Dout = w.shape
    assert K == k
    row_tile = min(row_tile, N)
    assert N % row_tile == 0

    bsum = jnp.sum(b, axis=0, keepdims=True).astype(jnp.float32)    # (1, Dout)

    y, psum, psumsq = pl.pallas_call(
        functools.partial(gcn_kernel, k=k),
        out_shape=(
            jax.ShapeDtypeStruct((B, N, Dout), jnp.float32),
            jax.ShapeDtypeStruct((B, 1, Dout), jnp.float32),
            jax.ShapeDtypeStruct((B, 1, Dout), jnp.float32),
        ),
        grid=(B,),
        in_specs=[
            pl.BlockSpec((1, N, N), lambda bi: (bi, 0, 0)),
            pl.BlockSpec((1, N, Din), lambda bi: (bi, 0, 0)),
            pl.BlockSpec((K, Din, Dout), lambda bi: (0, 0, 0)),
            pl.BlockSpec((1, Dout), lambda bi: (0, 0)),
        ],
        out_specs=(
            pl.BlockSpec((1, N, Dout), lambda bi: (bi, 0, 0)),
            pl.BlockSpec((1, 1, Dout), lambda bi: (bi, 0, 0)),
            pl.BlockSpec((1, 1, Dout), lambda bi: (bi, 0, 0)),
        ),
        compiler_params=pltpu.CompilerParams(
            dimension_semantics=("parallel",),
            vmem_limit_bytes=32 * 1024 * 1024,
        ),
    )(a, x, w, bsum)

    # Tiny (B, Dout) -> (Dout,) combine of the partial stats (f32 throughout),
    # forming var = E[y^2] - E[y]^2 only at the end; fold gamma/beta in.
    count = B * N
    mean = jnp.sum(psum[:, 0, :], axis=0) / count
    meansq = jnp.sum(psumsq[:, 0, :], axis=0) / count
    var = meansq - mean * mean                       # biased variance (training BN)
    inv = jax.lax.rsqrt(var + 1e-5)
    scale_vec = gamma * inv
    shift_vec = beta - mean * scale_vec
    scale = scale_vec.reshape(1, Dout).astype(jnp.float32)
    shift = shift_vec.reshape(1, Dout).astype(jnp.float32)

    out = pl.pallas_call(
        bn_lrelu_kernel,
        out_shape=jax.ShapeDtypeStruct((B, N, Dout), jnp.float32),
        grid=(B, N // row_tile),
        in_specs=[
            pl.BlockSpec((1, row_tile, Dout), lambda bi, ri: (bi, ri, 0)),
            pl.BlockSpec((1, Dout), lambda bi, ri: (0, 0)),
            pl.BlockSpec((1, Dout), lambda bi, ri: (0, 0)),
        ],
        out_specs=pl.BlockSpec((1, row_tile, Dout), lambda bi, ri: (bi, ri, 0)),
        input_output_aliases={0: 0},                 # normalize y in place
        compiler_params=pltpu.CompilerParams(
            dimension_semantics=("parallel", "parallel"),
        ),
    )(y, scale, shift)
    return out


# ---------------------------------------------------------------------------
# Pure-JAX references
# ---------------------------------------------------------------------------
def mpnn_mk_v2_reference_f32(x, a, w, b, gamma, beta, *, k):
    """Exact mirror of the PyTorch forward in float32."""
    acc = None
    a_pow = a
    for kk in range(k):
        if kk > 0:
            a_pow = jnp.einsum("bij,bjk->bik", a_pow, a)
        ax = jnp.einsum("bij,bjd->bid", a_pow, x)
        out_k = jnp.einsum("bid,de->bie", ax, w[kk]) + b[kk]
        acc = out_k if acc is None else acc + out_k
    mean = jnp.mean(acc, axis=(0, 1), keepdims=True)
    var = jnp.mean((acc - mean) ** 2, axis=(0, 1), keepdims=True)
    y = (acc - mean) * jax.lax.rsqrt(var + 1e-5)
    y = y * gamma + beta
    return jnp.where(y >= 0, y, 0.01 * y)


def mpnn_mk_v2_reference_matched(x, a, w, b, gamma, beta, *, k):
    """Precision-matched reference: same bf16 casts / recurrence / stat math."""
    a_bf = a.astype(jnp.bfloat16)
    prop = x.astype(jnp.bfloat16)
    w_bf = w.astype(jnp.bfloat16)
    B, N, _ = x.shape
    Dout = w.shape[-1]
    acc = jnp.zeros((B, N, Dout), jnp.float32)
    for kk in range(k):
        prop = jnp.einsum("bij,bjd->bid", a_bf, prop,
                          preferred_element_type=jnp.float32).astype(jnp.bfloat16)
        acc = acc + jnp.einsum("bnd,de->bne", prop, w_bf[kk],
                               preferred_element_type=jnp.float32)
    y = acc + jnp.sum(b, axis=0)
    count = B * N
    mean = jnp.sum(y, axis=(0, 1)) / count
    meansq = jnp.sum(y * y, axis=(0, 1)) / count
    var = meansq - mean * mean
    inv = jax.lax.rsqrt(var + 1e-5)
    scale = gamma * inv
    shift = beta - mean * scale
    z = y * scale + shift
    return jnp.where(z >= 0, z, 0.01 * z)


if __name__ == "__main__":
    # Small, lane-dense shapes: batch=2, nodes=128, Din=Dout=128, k=3.
    B, N, Din, Dout, K = 2, 128, 128, 128, 3

    key = jax.random.PRNGKey(0)
    kx, ka, kw, kb, kg, kbt = jax.random.split(key, 6)

    x = jax.random.normal(kx, (B, N, Din), dtype=jnp.float32)
    a_raw = jax.random.uniform(ka, (B, N, N), dtype=jnp.float32)
    a = a_raw / jnp.sum(a_raw, axis=-1, keepdims=True)       # row-normalized adjacency
    # Linear params stored as (K, Din, Dout) = nn.Linear weight transposed; bias (K, Dout).
    w = jax.random.normal(kw, (K, Din, Dout), dtype=jnp.float32) * 0.1
    b = jax.random.normal(kb, (K, Dout), dtype=jnp.float32) * 0.1
    # Non-trivial BatchNorm affine params (same semantics as PyTorch weight/bias).
    gamma = 1.0 + 0.1 * jax.random.normal(kg, (Dout,), dtype=jnp.float32)
    beta = 0.1 * jax.random.normal(kbt, (Dout,), dtype=jnp.float32)

    out = mpnn_mk_v2_forward(x, a, w, b, gamma, beta, k=K)
    out = jax.block_until_ready(out)
    assert out.shape == (B, N, Dout)

    # Tight check: kernels implement exactly the intended (bf16-input, f32-acc)
    # computation.
    ref_matched = mpnn_mk_v2_reference_matched(x, a, w, b, gamma, beta, k=K)
    assert jnp.allclose(out, ref_matched, atol=2e-3, rtol=2e-3), \
        float(jnp.max(jnp.abs(out - ref_matched)))

    # Sanity check against the exact f32 PyTorch-equivalent forward; tolerance
    # accounts for bf16 MXU inputs and BN's 1/sigma amplification of those
    # quantization errors.
    ref_f32 = mpnn_mk_v2_reference_f32(x, a, w, b, gamma, beta, k=K)
    assert jnp.allclose(out, ref_f32, atol=1e-1, rtol=1e-1), \
        float(jnp.max(jnp.abs(out - ref_f32)))

    print("KERNEL_OK")
</pallas_src>

<mosaic_0001>
module attributes {stable_mosaic.version = 11 : i64} {
  func.func @gcn_kernel(%arg0: i32, %arg1: memref<1x128x128xf32, #tpu.memory_space<vmem>>, %arg2: memref<1x128x128xf32, #tpu.memory_space<vmem>>, %arg3: memref<3x128x128xf32, #tpu.memory_space<vmem>>, %arg4: memref<1x128xf32, #tpu.memory_space<vmem>>, %arg5: memref<1x128x128xf32, #tpu.memory_space<vmem>>, %arg6: memref<1x1x128xf32, #tpu.memory_space<vmem>>, %arg7: memref<1x1x128xf32, #tpu.memory_space<vmem>>) attributes {dimension_semantics = [#tpu.dimension_semantics<parallel>], iteration_bounds = array<i64: 2>, scalar_prefetch = 0 : i64, scratch_operands = 0 : i64, tpu.core_type = #tpu.core_type<tc>, window_params = [{transform_indices = @transform_0, window_bounds = array<i64: 1, 128, 128>}, {transform_indices = @transform_1, window_bounds = array<i64: 1, 128, 128>}, {pipeline_mode = #tpu.pipeline_mode<synchronous>, transform_indices = @transform_2, window_bounds = array<i64: 3, 128, 128>}, {pipeline_mode = #tpu.pipeline_mode<synchronous>, transform_indices = @transform_3, window_bounds = array<i64: 1, 128>}, {transform_indices = @transform_4, window_bounds = array<i64: 1, 128, 128>}, {transform_indices = @transform_5, window_bounds = array<i64: 1, 1, 128>}, {transform_indices = @transform_6, window_bounds = array<i64: 1, 1, 128>}]} {
    %c0 = arith.constant 0 : index
    %c0_0 = arith.constant 0 : index
    %c0_1 = arith.constant 0 : index
    %0 = vector.load %arg1[%c0, %c0_0, %c0_1] : memref<1x128x128xf32, #tpu.memory_space<vmem>>, vector<1x128x128xf32>
    %1 = vector.shape_cast %0 : vector<1x128x128xf32> to vector<128x128xf32>
    %2 = arith.truncf %1 : vector<128x128xf32> to vector<128x128xbf16>
    %c0_2 = arith.constant 0 : index
    %c0_3 = arith.constant 0 : index
    %c0_4 = arith.constant 0 : index
    %3 = vector.load %arg2[%c0_2, %c0_3, %c0_4] : memref<1x128x128xf32, #tpu.memory_space<vmem>>, vector<1x128x128xf32>
    %4 = vector.shape_cast %3 : vector<1x128x128xf32> to vector<128x128xf32>
    %5 = arith.truncf %4 : vector<128x128xf32> to vector<128x128xbf16>
    %c0_5 = arith.constant 0 : index
    %c0_6 = arith.constant 0 : index
    %c0_7 = arith.constant 0 : index
    %6 = vector.load %arg3[%c0_5, %c0_6, %c0_7] : memref<3x128x128xf32, #tpu.memory_space<vmem>>, vector<3x128x128xf32>
    %7 = arith.truncf %6 : vector<3x128x128xf32> to vector<3x128x128xbf16>
    %cst = arith.constant 0.000000e+00 : f32
    %8 = vector.broadcast %cst : f32 to vector<128x128xf32>
    %cst_8 = arith.constant dense<0.000000e+00> : vector<128x128xf32>
    %9 = tpu.matmul %2, %5, %cst_8 {dimension_numbers = #tpu.dot_dimension_numbers<[1], [0], [0], [1], [0, 0, 1, 1], [], []>} : vector<128x128xbf16>, vector<128x128xbf16>, vector<128x128xf32> -> vector<128x128xf32>
    %10 = arith.truncf %9 : vector<128x128xf32> to vector<128x128xbf16>
    %11 = vector.extract_strided_slice %7 {offsets = [0, 0, 0], sizes = [1, 128, 128], strides = [1, 1, 1]} : vector<3x128x128xbf16> to vector<1x128x128xbf16>
    %12 = vector.shape_cast %11 : vector<1x128x128xbf16> to vector<128x128xbf16>
    %cst_9 = arith.constant dense<0.000000e+00> : vector<128x128xf32>
    %13 = tpu.matmul %10, %12, %cst_9 {dimension_numbers = #tpu.dot_dimension_numbers<[1], [0], [0], [1], [0, 0, 1, 1], [], []>} : vector<128x128xbf16>, vector<128x128xbf16>, vector<128x128xf32> -> vector<128x128xf32>
    %14 = arith.addf %8, %13 : vector<128x128xf32>
    %cst_10 = arith.constant dense<0.000000e+00> : vector<128x128xf32>
    %15 = tpu.matmul %2, %10, %cst_10 {dimension_numbers = #tpu.dot_dimension_numbers<[1], [0], [0], [1], [0, 0, 1, 1], [], []>} : vector<128x128xbf16>, vector<128x128xbf16>, vector<128x128xf32> -> vector<128x128xf32>
    %16 = arith.truncf %15 : vector<128x128xf32> to vector<128x128xbf16>
    %17 = vector.extract_strided_slice %7 {offsets = [1, 0, 0], sizes = [1, 128, 128], strides = [1, 1, 1]} : vector<3x128x128xbf16> to vector<1x128x128xbf16>
    %18 = vector.shape_cast %17 : vector<1x128x128xbf16> to vector<128x128xbf16>
    %cst_11 = arith.constant dense<0.000000e+00> : vector<128x128xf32>
    %19 = tpu.matmul %16, %18, %cst_11 {dimension_numbers = #tpu.dot_dimension_numbers<[1], [0], [0], [1], [0, 0, 1, 1], [], []>} : vector<128x128xbf16>, vector<128x128xbf16>, vector<128x128xf32> -> vector<128x128xf32>
    %20 = arith.addf %14, %19 : vector<128x128xf32>
    %cst_12 = arith.constant dense<0.000000e+00> : vector<128x128xf32>
    %21 = tpu.matmul %2, %16, %cst_12 {dimension_numbers = #tpu.dot_dimension_numbers<[1], [0], [0], [1], [0, 0, 1, 1], [], []>} : vector<128x128xbf16>, vector<128x128xbf16>, vector<128x128xf32> -> vector<128x128xf32>
    %22 = arith.truncf %21 : vector<128x128xf32> to vector<128x128xbf16>
    %23 = vector.extract_strided_slice %7 {offsets = [2, 0, 0], sizes = [1, 128, 128], strides = [1, 1, 1]} : vector<3x128x128xbf16> to vector<1x128x128xbf16>
    %24 = vector.shape_cast %23 : vector<1x128x128xbf16> to vector<128x128xbf16>
    %cst_13 = arith.constant dense<0.000000e+00> : vector<128x128xf32>
    %25 = tpu.matmul %22, %24, %cst_13 {dimension_numbers = #tpu.dot_dimension_numbers<[1], [0], [0], [1], [0, 0, 1, 1], [], []>} : vector<128x128xbf16>, vector<128x128xbf16>, vector<128x128xf32> -> vector<128x128xf32>
    %26 = arith.addf %20, %25 : vector<128x128xf32>
    %c0_14 = arith.constant 0 : index
    %c0_15 = arith.constant 0 : index
    %27 = vector.load %arg4[%c0_14, %c0_15] : memref<1x128xf32, #tpu.memory_space<vmem>>, vector<1x128xf32>
    %28 = vector.broadcast %27 : vector<1x128xf32> to vector<128x128xf32>
    %29 = arith.addf %26, %28 : vector<128x128xf32>
    %c0_16 = arith.constant 0 : index
    %c0_17 = arith.constant 0 : index
    %c0_18 = arith.constant 0 : index
    %30 = vector.load %arg5[%c0_16, %c0_17, %c0_18] : memref<1x128x128xf32, #tpu.memory_space<vmem>>, vector<1x128x128xf32>
    %31 = vector.shape_cast %30 : vector<1x128x128xf32> to vector<128x128xf32>
    %32 = vector.shape_cast %29 : vector<128x128xf32> to vector<1x128x128xf32>
    tpu.vector_store %arg5[%c0_16, %c0_17, %c0_18], %32 {strides = array<i32>} : memref<1x128x128xf32, #tpu.memory_space<vmem>>, vector<1x128x128xf32>,
    %cst_19 = arith.constant dense<0.000000e+00> : vector<128xf32>
    %33 = vector.multi_reduction <add>, %29, %cst_19 [0] : vector<128x128xf32> to vector<128xf32>
    %34 = vector.shape_cast %33 : vector<128xf32> to vector<1x128xf32>
    %c0_20 = arith.constant 0 : index
    %c0_21 = arith.constant 0 : index
    %c0_22 = arith.constant 0 : index
    %35 = vector.load %arg6[%c0_20, %c0_21, %c0_22] : memref<1x1x128xf32, #tpu.memory_space<vmem>>, vector<1x1x128xf32>
    %36 = vector.shape_cast %35 : vector<1x1x128xf32> to vector<1x128xf32>
    %37 = vector.shape_cast %34 : vector<1x128xf32> to vector<1x1x128xf32>
    tpu.vector_store %arg6[%c0_20, %c0_21, %c0_22], %37 {strides = array<i32>} : memref<1x1x128xf32, #tpu.memory_space<vmem>>, vector<1x1x128xf32>,
    %38 = arith.mulf %29, %29 : vector<128x128xf32>
    %cst_23 = arith.constant dense<0.000000e+00> : vector<128xf32>
    %39 = vector.multi_reduction <add>, %38, %cst_23 [0] : vector<128x128xf32> to vector<128xf32>
    %40 = vector.shape_cast %39 : vector<128xf32> to vector<1x128xf32>
    %c0_24 = arith.constant 0 : index
    %c0_25 = arith.constant 0 : index
    %c0_26 = arith.constant 0 : index
    %41 = vector.load %arg7[%c0_24, %c0_25, %c0_26] : memref<1x1x128xf32, #tpu.memory_space<vmem>>, vector<1x1x128xf32>
    %42 = vector.shape_cast %41 : vector<1x1x128xf32> to vector<1x128xf32>
    %43 = vector.shape_cast %40 : vector<1x128xf32> to vector<1x1x128xf32>
    tpu.vector_store %arg7[%c0_24, %c0_25, %c0_26], %43 {strides = array<i32>} : memref<1x1x128xf32, #tpu.memory_space<vmem>>, vector<1x1x128xf32>,
    return
  }
  func.func @transform_0(%arg0: i32) -> (i32, i32, i32) {
    %c0_i32 = arith.constant 0 : i32
    %c0_i32_0 = arith.constant 0 : i32
    %c0_i32_1 = arith.constant 0 : i32
    return %arg0, %c0_i32, %c0_i32_0 : i32, i32, i32
  }
  func.func @transform_1(%arg0: i32) -> (i32, i32, i32) {
    %c0_i32 = arith.constant 0 : i32
    %c0_i32_0 = arith.constant 0 : i32
    %c0_i32_1 = arith.constant 0 : i32
    return %arg0, %c0_i32, %c0_i32_0 : i32, i32, i32
  }
  func.func @transform_2(%arg0: i32) -> (i32, i32, i32) {
    %c0_i32 = arith.constant 0 : i32
    %c0_i32_0 = arith.constant 0 : i32
    %c0_i32_1 = arith.constant 0 : i32
    %c0_i32_2 = arith.constant 0 : i32
    return %c0_i32, %c0_i32_0, %c0_i32_1 : i32, i32, i32
  }
  func.func @transform_3(%arg0: i32) -> (i32, i32) {
    %c0_i32 = arith.constant 0 : i32
    %c0_i32_0 = arith.constant 0 : i32
    %c0_i32_1 = arith.constant 0 : i32
    return %c0_i32, %c0_i32_0 : i32, i32
  }
  func.func @transform_4(%arg0: i32) -> (i32, i32, i32) {
    %c0_i32 = arith.constant 0 : i32
    %c0_i32_0 = arith.constant 0 : i32
    %c0_i32_1 = arith.constant 0 : i32
    return %arg0, %c0_i32, %c0_i32_0 : i32, i32, i32
  }
  func.func @transform_5(%arg0: i32) -> (i32, i32, i32) {
    %c0_i32 = arith.constant 0 : i32
    %c0_i32_0 = arith.constant 0 : i32
    %c0_i32_1 = arith.constant 0 : i32
    return %arg0, %c0_i32, %c0_i32_0 : i32, i32, i32
  }
  func.func @transform_6(%arg0: i32) -> (i32, i32, i32) {
    %c0_i32 = arith.constant 0 : i32
    %c0_i32_0 = arith.constant 0 : i32
    %c0_i32_1 = arith.constant 0 : i32
    return %arg0, %c0_i32, %c0_i32_0 : i32, i32, i32
  }
}

module attributes {stable_mosaic.version = 11 : i64} {
  func.func @bn_lrelu_kernel(%arg0: i32, %arg1: i32, %arg2: memref<1x128x128xf32, #tpu.memory_space<vmem>>, %arg3: memref<1x128xf32, #tpu.memory_space<vmem>>, %arg4: memref<1x128xf32, #tpu.memory_space<vmem>>, %arg5: memref<1x128x128xf32, #tpu.memory_space<vmem>>) attributes {dimension_semantics = [#tpu.dimension_semantics<parallel>, #tpu.dimension_semantics<parallel>], iteration_bounds = array<i64: 2, 1>, scalar_prefetch = 0 : i64, scratch_operands = 0 : i64, tpu.core_type = #tpu.core_type<tc>, window_params = [{transform_indices = @transform_0, window_bounds = array<i64: 1, 128, 128>}, {pipeline_mode = #tpu.pipeline_mode<synchronous>, transform_indices = @transform_1, window_bounds = array<i64: 1, 128>}, {pipeline_mode = #tpu.pipeline_mode<synchronous>, transform_indices = @transform_2, window_bounds = array<i64: 1, 128>}, {transform_indices = @transform_3, window_bounds = array<i64: 1, 128, 128>}]} {
    %c0 = arith.constant 0 : index
    %c0_0 = arith.constant 0 : index
    %c0_1 = arith.constant 0 : index
    %0 = vector.load %arg2[%c0, %c0_0, %c0_1] : memref<1x128x128xf32, #tpu.memory_space<vmem>>, vector<1x128x128xf32>
    %c0_2 = arith.constant 0 : index
    %c0_3 = arith.constant 0 : index
    %1 = vector.load %arg3[%c0_2, %c0_3] : memref<1x128xf32, #tpu.memory_space<vmem>>, vector<1x128xf32>
    %2 = vector.shape_cast %1 : vector<1x128xf32> to vector<1x1x128xf32>
    %3 = vector.broadcast %2 : vector<1x1x128xf32> to vector<1x128x128xf32>
    %4 = arith.mulf %0, %3 : vector<1x128x128xf32>
    %c0_4 = arith.constant 0 : index
    %c0_5 = arith.constant 0 : index
    %5 = vector.load %arg4[%c0_4, %c0_5] : memref<1x128xf32, #tpu.memory_space<vmem>>, vector<1x128xf32>
    %6 = vector.shape_cast %5 : vector<1x128xf32> to vector<1x1x128xf32>
    %7 = vector.broadcast %6 : vector<1x1x128xf32> to vector<1x128x128xf32>
    %8 = arith.addf %4, %7 : vector<1x128x128xf32>
    %cst = arith.constant 0.000000e+00 : f32
    %9 = vector.broadcast %cst : f32 to vector<1x128x128xf32>
    %10 = arith.cmpf oge, %8, %9 : vector<1x128x128xf32>
    %cst_6 = arith.constant 0.00999999977 : f32
    %11 = vector.broadcast %cst_6 : f32 to vector<1x128x128xf32>
    %12 = arith.mulf %11, %8 : vector<1x128x128xf32>
    %13 = arith.select %10, %8, %12 : vector<1x128x128xi1>, vector<1x128x128xf32>
    %c0_7 = arith.constant 0 : index
    %c0_8 = arith.constant 0 : index
    %c0_9 = arith.constant 0 : index
    %14 = vector.load %arg5[%c0_7, %c0_8, %c0_9] : memref<1x128x128xf32, #tpu.memory_space<vmem>>, vector<1x128x128xf32>
    tpu.vector_store %arg5[%c0_7, %c0_8, %c0_9], %13 {strides = array<i32>} : memref<1x128x128xf32, #tpu.memory_space<vmem>>, vector<1x128x128xf32>,
    return
  }
  func.func @transform_0(%arg0: i32, %arg1: i32) -> (i32, i32, i32) {
    %c0_i32 = arith.constant 0 : i32
    %c0_i32_0 = arith.constant 0 : i32
    return %arg0, %arg1, %c0_i32 : i32, i32, i32
  }
  func.func @transform_1(%arg0: i32, %arg1: i32) -> (i32, i32) {
    %c0_i32 = arith.constant 0 : i32
    %c0_i32_0 = arith.constant 0 : i32
    %c0_i32_1 = arith.constant 0 : i32
    return %c0_i32, %c0_i32_0 : i32, i32
  }
  func.func @transform_2(%arg0: i32, %arg1: i32) -> (i32, i32) {
    %c0_i32 = arith.constant 0 : i32
    %c0_i32_0 = arith.constant 0 : i32
    %c0_i32_1 = arith.constant 0 : i32
    return %c0_i32, %c0_i32_0 : i32, i32
  }
  func.func @transform_3(%arg0: i32, %arg1: i32) -> (i32, i32, i32) {
    %c0_i32 = arith.constant 0 : i32
    %c0_i32_0 = arith.constant 0 : i32
    return %arg0, %arg1, %c0_i32 : i32, i32, i32
  }
}

</mosaic_0001>

<bundles_post_ra>
// kernel: mpnn_mk_v2_forward.3
= control target key start
LH: loop header
LB: loop body
LE: loop exit
PB: predicated region body
PF: predicated region fallthrough
CT: control target
= control target key end

     0   :  { %8 = vsyncpa [#allocation3], 0  ;;  %s923_s0 = inlined_call_operand.hbm [shape: f32[2,128,128], index: 0, kind: input, shape index: {}, may-alias: {0,3}]   ;;  %s924_s1 = inlined_call_operand.vmem [shape: f32[1,128], index: 1, kind: input, shape index: {}]   ;;  %s925_s2 = inlined_call_operand.vmem [shape: f32[1,128], index: 2, kind: input, shape index: {}]   ;;  %s926_s3 = inlined_call_operand.hbm [shape: f32[2,128,128], index: 3, kind: output, shape index: {}, may-alias: {0,3}]  }
   0x1   :  { %10 = vsyncpa [#allocation3 + $0x1], 0 }
   0x2   :  { %11 = vsyncpa [#allocation4], 0 }
   0x3   :  { %13 = vsyncpa [#allocation4 + $0x1], 0  ;;  %s663_s12 = smov 0   ;;  %s665_s13 = smov 0  }
   0x4   :  { %s667_s14 = smov 0   ;;  %s669_s15 = smov 0  }
   0x5   :  { %s671_s16 = smov 0   ;;  %s673_s17 = smov 0  }
   0x6 LB: > { %s438_s18 = sadd.s32 4294967295, %s635_s17   ;;  %s439_s19 = sadd.s32 4294967294, %s635_s17   ;;  %s635_s17 = sphi %s673_s17, %s19_s17   ;;  %s631_s16 = sphi %s671_s16, %s941_s16   ;;  %s627_s15 = sphi %s669_s15, %s940_s15   ;;  %s623_s14 = sphi %s667_s14, %s939_s14   ;;  %s619_s13 = sphi %s665_s13, %s938_s13   ;;  %s615_s12 = sphi %s663_s12, %s937_s12  }
   0x7   : > { %s31_s20 = sadd.s32 1, %s631_s16  ;;  %s40_s21 = sadd.s32 1, %s623_s14 }
   0x8   : > { %p33_p0 = scmp.ge.s32.totalorder %s31_s20, 2  ;;  %p47_p1 = scmp.ne.s32.totalorder %s623_s14, %s619_s13 }
   0x9   : > { %p48_p2 = scmp.eq.s32.totalorder %s635_s17, 0  ;;  %p53_p3 = scmp.ne.s32.totalorder %s619_s13, %s615_s12 }
   0xa   : > { %s943_s20 = smov (%p33_p0, %s31_s20), 0  ;;  %p54_p5 = scmp.eq.s32.totalorder %s438_s18, 0 }
   0xb   : > { %p704_p4 = por %p48_p2, %p47_p1  ;;  %s35_s23 = ssub.s32 %s631_s16, %s943_s20 }
   0xc   : > { %p121_p6 = scmp.eq.s32.totalorder %s438_s18, 1  ;;  %p38_p7 = scmp.eq.s32.totalorder %s35_s23, 0 }
   0xd   : > { %p710_p8 = por %p54_p5, %p53_p3  ;;  %p127_p10 = scmp.eq.s32.totalorder %s439_s19, 1 }
   0xe   : > { %p714_p9 = por %p121_p6, %p47_p1  ;;  %p469_p13 = scmp.lt.s32.totalorder %s635_s17, 2 }
   0xf   : > { %s719_s26 = scalar_select %p38_p7, %s623_s14, %s40_s21  }
  0x10   : > { %s930_s25 = scalar_select %p714_p9, 1, 0 }
  0x11   : > { %p721_p11 = por %p127_p10, %p53_p3  ;;  %s153_s28 = sand.u32 1, %s623_s14  }
  0x12   : > { %s442_s29 = sshll.u32 %s153_s28, 7  ;;  %s455_s30 = sshll.u32 %s631_s16, 11 }
  0x13   : > { %s931_s27 = scalar_select %p721_p11, 1, 0 }
  0x14   : > { %s732_s6 = scalar_lea.hbm %s923_s0, %s455_s30  ;;  %s157_s7 = scalar_lea.vmem [#allocation2], %s442_s29 }
  0x15   : > { %s166_s8 = sshll.u32 %s157_s7, 4  ;;  %p738_p0 = pnand %p469_p13, %p704_p4  ;;  %s734_s8 = int_to_ptr.vmem [resolvable:$true] %s166_s8 }
  0x16   : > { %s743_s10 = scalar_lea.sflag [#allocation3], %s153_s28  ;;  %s523_s11 = scalar_lea.hbm %s732_s6, 2048 }
  0x17   : > { %p524_p2 = scmp.ne.s32.totalorder %s732_s6, %s523_s11  ;;  %p525_p3 = pneg %p738_p0 }
  0x18   : > { %s528_s21 = scalar_lea.hbm %s923_s0, 4096  ;;  %p529_p4 = scmp.lt.u32.totalorder %s732_s6, %s923_s0 }
  0x19   : > { %p526_p5 = pnand %p525_p3, %p524_p2  ;;  %p530_p7 = scmp.lt.u32.totalorder %s528_s21, %s523_s11 }
  0x1a   : > { %p532_p13 = scmp.lt.u32.totalorder %s523_s11, %s732_s6 }
  0x1b   : > { %p527_p6 = pneg %p526_p5  ;;  %p531_p10 = por %p530_p7, %p529_p4 }
  0x1d   : > { %p533_p12 = por %p532_p13, %p531_p10 }
  0x1f   : > { %p534_p1 = pnand %p533_p12, %p527_p6 }
  0x21   : > { %537 = shalt.err (!%p534_p1)
}
  0x22   : > { %s538_s28 = scalar_lea.vmem %s734_s8, 2048  ;;  %s637_s29 = smov [#allocation2]  }
  0x23   : > { %p539_p2 = scmp.ne.s32.totalorder %s734_s8, %s538_s28  ;;  %s543_s30 = sshll.u32 %s637_s29, 4  ;;  %s544_s30 = int_to_ptr.vmem [resolvable:$false] %s543_s30 }
  0x24   : > { %s545_s4 = scalar_lea.vmem %s544_s30, 4096  ;;  %p546_p9 = scmp.lt.s32.totalorder %s734_s8, %s544_s30 }
  0x25   : > { %p541_p5 = pnand %p539_p2, %p525_p3  ;;  %p547_p4 = scmp.lt.s32.totalorder %s545_s4, %s538_s28 }
  0x27   : > { %p542_p11 = pneg %p541_p5  ;;  %p548_p7 = por %p547_p4, %p546_p9 }
  0x29   : > { %p549_p10 = pnand %p548_p7, %p542_p11 }
  0x2b   : > { %552 = shalt.err (!%p549_p10)
}
  0x2c   : > { %s638_s5 = smov 128   ;;  %s639_s7 = smov 8  }
  0x2d   : > { %464 = dma.hbm_to_vmem [thread:$0]  (!%p738_p0), %s732_s6, 2048, %s734_s8, %s743_s10, %s638_s5, %s638_s5, %s639_s7  }
  0x2e   : > { %p174_p12 = scmp.lt.s32.totalorder %s635_s17, 3  ;;  %p933_p1 = scmp.ge.s32.totalorder %s635_s17, 1 }
  0x30   : > { %p175_p3 = pnand %p933_p1, %p174_p12 }
  0x31   : > { %s775_s11 = sand.u32 (!%p175_p3), 1, %s619_s13  }
  0x32   : > { %178 = sbr.rel (%p175_p3) target bundleno = 100 (0x64), region = 32  ;;  %s446_s18 = sshll.u32 (!%p175_p3), %s775_s11, 7 }
  0x33   : > { %s181_s19 = scalar_lea.sflag (!%p175_p3), [#allocation3], %s775_s11  ;;  %s781_s21 = scalar_lea.vmem (!%p175_p3), [#allocation2], %s446_s18 }
  0x39   : > { %606 = dma.done.wait (%p710_p8), %s181_s19, 2048  }
  0x3a   : > { %608 = vsyncadd (%p710_p8), %s181_s19, 4294965248  ;;  %v209_v0 = vld [vmem:[%s781_s21] sm:$0xff]  ;;  %v210_v4 = vld [vmem:[%s781_s21 + $0x8] sm:$0xff]  ;;  %s824_s24 = scalar_lea.vmem [#allocation5], %s446_s18  ;;  %s456_s22 = sshll.u32 %s627_s15, 11 }
  0x3b   : > { %v791_v1 = vld [vmem:[%s924_s1] ss:$0 sm:$0xff]  ;;  %v211_v5 = vld [vmem:[%s781_s21 + $0x10] sm:$0xff]  ;;  %v212_v6 = vld [vmem:[%s781_s21 + $0x18] sm:$0xff]  ;;  %s351_s23 = sshll.u32 %s824_s24, 4  ;;  %s870_s30 = scalar_lea.hbm %s926_s3, %s456_s22  ;;  %s872_s23 = int_to_ptr.vmem [resolvable:$true] %s351_s23 }
  0x3c   : > { %v796_v2 = vld [vmem:[%s925_s2] ss:$0 sm:$0xff]  ;;  %v232_v3 = vmul.f32 %v791_v1, %v209_v0  ;;  %v233_v7 = vmul.f32 %v791_v1, %v210_v4  ;;  %v234_v8 = vmul.f32 %v791_v1, %v211_v5  ;;  %v235_v9 = vmul.f32 %v791_v1, %v212_v6  ;;  %v214_v11 = vld [vmem:[%s781_s21 + $0x28] sm:$0xff]  ;;  %v215_v12 = vld [vmem:[%s781_s21 + $0x30] sm:$0xff]  ;;  %s336_s15 = scalar_lea.sflag [#allocation4], %s775_s11  ;;  %s553_s4 = scalar_lea.vmem %s872_s23, 2048 }
  0x3d   : > { %v213_v10 = vld [vmem:[%s781_s21 + $0x20] sm:$0xff]  ;;  %v237_v15 = vmul.f32 %v791_v1, %v214_v11  ;;  %v238_v16 = vmul.f32 %v791_v1, %v215_v12  ;;  %v216_v17 = vld [vmem:[%s781_s21 + $0x38] sm:$0xff]  ;;  %v218_v30 = vld [vmem:[%s781_s21 + $0x48] sm:$0xff]  ;;  %p554_p8 = scmp.ne.s32.totalorder %s872_s23, %s553_s4  ;;  %p934_p9 = scmp.ne.s32.totalorder %s930_s25, 0 }
  0x3e   : > { %v255_v13 = vadd.f32 %v796_v2, %v232_v3  ;;  %v236_v14 = vmul.f32 %v791_v1, %v213_v10  ;;  %v256_v18 = vadd.f32 %v796_v2, %v233_v7  ;;  %v257_v19 = vadd.f32 %v796_v2, %v234_v8  ;;  %v217_v25 = vld [vmem:[%s781_s21 + $0x40] sm:$0xff]  ;;  %v219_v31 = vld [vmem:[%s781_s21 + $0x50] sm:$0xff]  ;;  %v220_v43 = vld [vmem:[%s781_s21 + $0x58] sm:$0xff]  ;;  %s640_s5 = smov [#allocation5]  }
  0x3f   : > { %v258_v20 = vadd.f32 %v796_v2, %v235_v9  ;;  %v239_v21 = vmul.f32 %v791_v1, %v216_v17  ;;  %v260_v24 = vadd.f32 %v796_v2, %v237_v15  ;;  %v261_v37 = vadd.f32 %v796_v2, %v238_v16  ;;  %v221_v44 = vld [vmem:[%s781_s21 + $0x60] sm:$0xff]  ;;  %v222_v45 = vld [vmem:[%s781_s21 + $0x68] sm:$0xff]  ;;  %v223_v56 = vld [vmem:[%s781_s21 + $0x70] sm:$0xff]  ;;  %p555_p11 = pnand %p554_p8, %p934_p9  ;;  %s557_s7 = sshll.u32 %s640_s5, 4  ;;  %s558_s7 = int_to_ptr.vmem [resolvable:$false] %s557_s7 }
  0x40   : > { %vm271_vm0 = vcmp.ge.f32.partialorder %v255_v13, 0.0  ;;  %v287_v22 = vmul.f32 0.01, %v255_v13  ;;  %v259_v23 = vadd.f32 %v796_v2, %v236_v14  ;;  %vm272_vm1 = vcmp.ge.f32.partialorder %v256_v18, 0.0  ;;  %v224_v4 = vld [vmem:[%s781_s21 + $0x78] sm:$0xff]  ;;  %s559_s18 = scalar_lea.vmem %s558_s7, 4096  ;;  %p560_p6 = scmp.lt.s32.totalorder %s872_s23, %s558_s7 }
  0x41   : > { %v288_v26 = vmul.f32 0.01, %v256_v18  ;;  %vm273_vm2 = vcmp.ge.f32.partialorder %v257_v19, 0.0  ;;  %v289_v27 = vmul.f32 0.01, %v257_v19  ;;  %vm274_vm3 = vcmp.ge.f32.partialorder %v258_v20, 0.0  ;;  %p556_p0 = pneg %p555_p11  ;;  %p561_p13 = scmp.lt.s32.totalorder %s559_s18, %s553_s4 }
  0x42   : > { %v303_v28 = vsel %vm271_vm0, %v255_v13, %v287_v22  ;;  %v290_v29 = vmul.f32 0.01, %v258_v20  ;;  %vm275_vm4 = vcmp.ge.f32.partialorder %v259_v23, 0.0  ;;  %v291_v34 = vmul.f32 0.01, %v259_v23 }
  0x43   : > { %319 = vst [vmem:[%s824_s24] sm:$0xff] %v303_v28  ;;  %v304_v32 = vsel %vm272_vm1, %v256_v18, %v288_v26  ;;  %v305_v33 = vsel %vm273_vm2, %v257_v19, %v289_v27  ;;  %vm276_vm5 = vcmp.ge.f32.partialorder %v260_v24, 0.0  ;;  %v292_v36 = vmul.f32 0.01, %v260_v24  ;;  %p562_p2 = por %p561_p13, %p560_p6 }
  0x44   : > { %320 = vst [vmem:[%s824_s24 + $0x8] sm:$0xff] %v304_v32  ;;  %321 = vst [vmem:[%s824_s24 + $0x10] sm:$0xff] %v305_v33  ;;  %v306_v35 = vsel %vm274_vm3, %v258_v20, %v290_v29  ;;  %v262_v38 = vadd.f32 %v796_v2, %v239_v21  ;;  %v307_v39 = vsel %vm275_vm4, %v259_v23, %v291_v34  ;;  %vm277_vm6 = vcmp.ge.f32.partialorder %v261_v37, 0.0 }
  0x45   : > { %322 = vst [vmem:[%s824_s24 + $0x18] sm:$0xff] %v306_v35  ;;  %v240_v40 = vmul.f32 %v791_v1, %v217_v25  ;;  %v241_v41 = vmul.f32 %v791_v1, %v218_v30  ;;  %v242_v42 = vmul.f32 %v791_v1, %v219_v31  ;;  %323 = vst [vmem:[%s824_s24 + $0x20] sm:$0xff] %v307_v39  ;;  %v293_v47 = vmul.f32 0.01, %v261_v37  ;;  %p563_p5 = pnand %p562_p2, %p556_p0 }
  0x46   : > { %v308_v46 = vsel %vm276_vm5, %v260_v24, %v292_v36  ;;  %vm278_vm7 = vcmp.ge.f32.partialorder %v262_v38, 0.0  ;;  %v294_v48 = vmul.f32 0.01, %v262_v38  ;;  %v243_v53 = vmul.f32 %v791_v1, %v220_v43 }
  0x47   : > { %324 = vst [vmem:[%s824_s24 + $0x28] sm:$0xff] %v308_v46  ;;  %v263_v49 = vadd.f32 %v796_v2, %v240_v40  ;;  %v264_v50 = vadd.f32 %v796_v2, %v241_v41  ;;  %v265_v51 = vadd.f32 %v796_v2, %v242_v42  ;;  %v309_v52 = vsel %vm277_vm6, %v261_v37, %v293_v47 }
  0x48   : > { %v244_v54 = vmul.f32 %v791_v1, %v221_v44  ;;  %v245_v55 = vmul.f32 %v791_v1, %v222_v45  ;;  %325 = vst [vmem:[%s824_s24 + $0x30] sm:$0xff] %v309_v52  ;;  %v310_v57 = vsel %vm278_vm7, %v262_v38, %v294_v48  ;;  %v266_v61 = vadd.f32 %v796_v2, %v243_v53 }
  0x49   : > { %vm279_vm8 = vcmp.ge.f32.partialorder %v263_v49, 0.0  ;;  %v295_v58 = vmul.f32 0.01, %v263_v49  ;;  %vm280_vm9 = vcmp.ge.f32.partialorder %v264_v50, 0.0  ;;  %326 = vst [vmem:[%s824_s24 + $0x38] sm:$0xff] %v310_v57  ;;  %vm281_vm10 = vcmp.ge.f32.partialorder %v265_v51, 0.0 }
  0x4a   : > { %v296_v59 = vmul.f32 0.01, %v264_v50  ;;  %v297_v60 = vmul.f32 0.01, %v265_v51  ;;  %v267_v63 = vadd.f32 %v796_v2, %v244_v54  ;;  %v268_v0 = vadd.f32 %v796_v2, %v245_v55 }
  0x4b   : > { %v311_v62 = vsel %vm279_vm8, %v263_v49, %v295_v58  ;;  %v246_v3 = vmul.f32 %v791_v1, %v223_v56  ;;  %vm282_vm11 = vcmp.ge.f32.partialorder %v266_v61, 0.0  ;;  %v298_v7 = vmul.f32 0.01, %v266_v61 }
  0x4c   : > { %327 = vst [vmem:[%s824_s24 + $0x40] sm:$0xff] %v311_v62  ;;  %v312_v5 = vsel %vm280_vm9, %v264_v50, %v296_v59  ;;  %v313_v6 = vsel %vm281_vm10, %v265_v51, %v297_v60  ;;  %vm283_vm12 = vcmp.ge.f32.partialorder %v267_v63, 0.0  ;;  %v299_v8 = vmul.f32 0.01, %v267_v63 }
  0x4d   : > { %328 = vst [vmem:[%s824_s24 + $0x48] sm:$0xff] %v312_v5  ;;  %329 = vst [vmem:[%s824_s24 + $0x50] sm:$0xff] %v313_v6  ;;  %vm284_vm13 = vcmp.ge.f32.partialorder %v268_v0, 0.0  ;;  %v300_v9 = vmul.f32 0.01, %v268_v0  ;;  %v314_v10 = vsel %vm282_vm11, %v266_v61, %v298_v7  ;;  %v269_v11 = vadd.f32 %v796_v2, %v246_v3 }
  0x4e   : > { %v247_v12 = vmul.f32 %v791_v1, %v224_v4  ;;  %330 = vst [vmem:[%s824_s24 + $0x58] sm:$0xff] %v314_v10  ;;  %v315_v13 = vsel %vm283_vm12, %v267_v63, %v299_v8 }
  0x4f   : > { %v316_v14 = vsel %vm284_vm13, %v268_v0, %v300_v9  ;;  %331 = vst [vmem:[%s824_s24 + $0x60] sm:$0xff] %v315_v13  ;;  %vm285_vm14 = vcmp.ge.f32.partialorder %v269_v11, 0.0  ;;  %v301_v15 = vmul.f32 0.01, %v269_v11 }
  0x50   : > { %332 = vst [vmem:[%s824_s24 + $0x68] sm:$0xff] %v316_v14  ;;  %v270_v16 = vadd.f32 %v796_v2, %v247_v12 }
  0x51   : > { %v317_v17 = vsel %vm285_vm14, %v269_v11, %v301_v15 }
  0x52   : > { %vm286_vm15 = vcmp.ge.f32.partialorder %v270_v16, 0.0  ;;  %v302_v18 = vmul.f32 0.01, %v270_v16  ;;  %333 = vst [vmem:[%s824_s24 + $0x70] sm:$0xff] %v317_v17 }
  0x54   : > { %v318_v1 = vsel %vm286_vm15, %v270_v16, %v302_v18 }
  0x55   : > { %334 = vst [vmem:[%s824_s24 + $0x78] sm:$0xff] %v318_v1 }
  0x56   : > { %566 = shalt.err (!%p563_p5)
}
  0x57   : > { %s567_s19 = scalar_lea.hbm %s870_s30, 2048  ;;  %s571_s8 = scalar_lea.hbm %s926_s3, 4096 }
  0x58   : > { %p568_p4 = scmp.ne.s32.totalorder %s870_s30, %s567_s19  ;;  %p572_p12 = scmp.lt.u32.totalorder %s870_s30, %s926_s3 }
  0x59   : > { %p573_p1 = scmp.lt.u32.totalorder %s571_s8, %s567_s19  ;;  %p575_p8 = scmp.lt.u32.totalorder %s567_s19, %s870_s30 }
  0x5a   : > { %p569_p7 = pnand %p568_p4, %p934_p9 }
  0x5b   : > { %p574_p3 = por %p573_p1, %p572_p12 }
  0x5c   : > { %p570_p10 = pneg %p569_p7 }
  0x5d   : > { %p576_p11 = por %p575_p8, %p574_p3 }
  0x5f   : > { %p577_p0 = pnand %p576_p11, %p570_p10 }
  0x61   : > { %580 = shalt.err (!%p577_p0)
}
  0x62   : > { %s641_s24 = smov 128   ;;  %s642_s22 = smov 8  }
  0x63   : > { %459 = dma.vmem_to_hbm [thread:$0]  (%p934_p9), %s872_s23, 2048, %s870_s30, %s336_s15, %s641_s24, %s641_s24, %s642_s22  }
  0x64 PF: > { %s366_s28 = sand.u32 1, %s615_s12   ;;  %p935_p6 = scmp.ne.s32.totalorder %s931_s27, 0 }
  0x65   : > { %p936_p13 = scmp.ge.s32.totalorder %s635_s17, 2  ;;  %s367_s29 = scalar_lea.sflag [#allocation4], %s366_s28 }
  0x67   : > { %p466_p2 = pnand %p936_p13, %p935_p6 }
  0x69   : > { %610 = dma.done.wait (!%p466_p2), %s367_s29, 2048  }
  0x6a   : > { %612 = vsyncadd (!%p466_p2), %s367_s29, 4294965248  ;;  %s19_s17 = sadd.s32 1, %s635_s17   ;;  %s937_s12 = smov %s619_s13 }
  0x6b   : > { %p16_p5 = scmp.ge.s32.totalorder %s19_s17, 4   ;;  %s938_s13 = smov %s623_s14 }
  0x6c   : > { %s939_s14 = smov %s719_s26  ;;  %s940_s15 = smov %s631_s16 }
  0x6d   : > { %s941_s16 = smov %s943_s20  ;;  %18 = sbr.rel (!%p16_p5) target bundleno = 6 (0x6), region = 77 }
  0x74   :  { %372 = vsyncpa [#allocation3], 1 }
  0x75   :  { %374 = vsyncpa [#allocation3 + $0x1], 1 }
  0x76   :  { %375 = vsyncpa [#allocation4], 1 }
  0x77   :  { %377 = vsyncpa [#allocation4 + $0x1], 1 }

// kernel: mpnn_mk_v2_forward.2
= control target key start
LH: loop header
LB: loop body
LE: loop exit
PB: predicated region body
PF: predicated region fallthrough
CT: control target
= control target key end

     0   :  { %s2391_s0 = inlined_call_operand.hbm [shape: f32[2,128,128], index: 0, kind: input, shape index: {}]   ;;  %s2392_s1 = inlined_call_operand.hbm [shape: f32[2,128,128], index: 1, kind: input, shape index: {}]   ;;  %s2393_s2 = inlined_call_operand.hbm [shape: f32[3,128,128], index: 2, kind: input, shape index: {}]   ;;  %s2394_s3 = inlined_call_operand.vmem [shape: f32[1,128], index: 3, kind: input, shape index: {}]   ;;  %s2395_s4 = inlined_call_operand.hbm [shape: f32[2,128,128], index: 4, kind: output, shape index: {0}]   ;;  %s2396_s5 = inlined_call_operand.vmem [shape: f32[2,1,128], index: 5, kind: output, shape index: {1}]   ;;  %s2397_s6 = inlined_call_operand.vmem [shape: f32[2,1,128], index: 6, kind: output, shape index: {2}]  }
   0x1   :  { %2408 = sst [smem:[#allocation16_spill]] %s2391_s0 }
   0x2   :  { %2409 = sst [smem:[#allocation17_spill]] %s2393_s2 }
   0x3   :  { %12 = vsyncpa [#allocation3], 0 }
   0x4   :  { %14 = vsyncpa [#allocation3 + $0x1], 0 }
   0x5   :  { %15 = vsyncpa [#allocation6], 0 }
   0x6   :  { %17 = vsyncpa [#allocation6 + $0x1], 0 }
   0x7   :  { %18 = vsyncpa [#allocation4], 0 }
   0x8   :  { %20 = vsyncpa [#allocation4 + $0x1], 0  ;;  %s1969_s21 = smov 0   ;;  %s1971_s22 = smov 0  }
   0x9   :  { %s1973_s23 = smov 0   ;;  %s1975_s24 = smov 0  }
   0xa LB: > { %2410 = sst [smem:[#allocation13_spill]] %s1920_s23  ;;  %s1990_s25 = sadd.s32 4294967295, %s1924_s24   ;;  %s1924_s24 = sphi %s1975_s24, %s2430_s24   ;;  %s1920_s23 = sphi %s1973_s23, %s2435_s23   ;;  %s1916_s22 = sphi %s1971_s22, %s2434_s22   ;;  %s1912_s21 = sphi %s1969_s21, %s2433_s21  }
   0xb   : > { %s1352_s26 = sadd.s32 4294967294, %s1924_s24   ;;  %p46_p0 = scmp.ne.s32.totalorder %s1916_s22, %s1912_s21 }
   0xc   : > { %p2398_p1 = scmp.eq.s32.totalorder %s1990_s25, 0  ;;  %p144_p3 = scmp.eq.s32.totalorder %s1352_s26, 1 }
   0xd   : > { %p1353_p5 = scmp.ge.s32.totalorder %s1924_s24, 1  ;;  %p203_p7 = scmp.lt.s32.totalorder %s1924_s24, 3 }
   0xe   : > { %p1999_p4 = por %p2398_p1, %p46_p0  ;;  %p2004_p6 = por %p144_p3, %p46_p0 }
   0xf   : > { %p2009_p8 = pnand %p1353_p5, %p203_p7  ;;  %s1926_s30 = smov [#allocation7]  }
  0x10   : > { %s2411_s27 = scalar_select %p1999_p4, 1, 0 }
  0x11   : > { %s2412_s28 = scalar_select %p2004_p6, 1, 0 }
  0x12   : > { %s2413_s29 = scalar_select %p2009_p8, 1, 0 }
  0x13   : > { %s215_s7 = sshll.u32 %s1926_s30, 4  ;;  %p1706_p9 = pneg %p2009_p8  ;;  %s2013_s7 = int_to_ptr.vmem [resolvable:$true] %s215_s7 }
  0x14   : > { %s2025_s9 = sadd.s32 1, %s1924_s24   ;;  %s33_s10 = sadd.s32 1, %s1920_s23 }
  0x15   : > { %p2020_p11 = pnand %p1706_p9, %p2398_p1  ;;  %2415 = sst [smem:[#allocation14_spill]] %s2025_s9 }
  0x16   : > { %s30_s11 = ssub.s32 %s1924_s24, %s2025_s9  ;;  %s2416_s2 = sld [smem:[#allocation17_spill]] }
  0x17   : > { %p1764_p13 = pneg %p2020_p11 }
  0x1c   : > { %s1762_s14 = scalar_lea.hbm %s2416_s2, 6144 }
  0x1d   : > { %p1763_p12 = scmp.ne.s32.totalorder %s2416_s2, %s1762_s14  ;;  %p1769_p5 = scmp.lt.u32.totalorder %s1762_s14, %s2416_s2 }
  0x1f   : > { %p1765_p0 = pnand %p1764_p13, %p1763_p12 }
  0x21   : > { %p1766_p3 = pneg %p1765_p0 }
  0x23   : > { %p1771_p7 = pnand %p1769_p5, %p1766_p3 }
  0x25   : > { %1774 = shalt.err (!%p1771_p7)
}
  0x26   : > { %s1775_s19 = scalar_lea.vmem %s2013_s7, 6144  ;;  %p1783_p2 = scmp.lt.s32.totalorder %s2013_s7, %s2013_s7 }
  0x27   : > { %p1776_p9 = scmp.ne.s32.totalorder %s2013_s7, %s1775_s19  ;;  %p1784_p6 = scmp.lt.s32.totalorder %s1775_s19, %s1775_s19 }
  0x29   : > { %p1778_p10 = pnand %p1776_p9, %p1764_p13  ;;  %p1785_p4 = por %p1784_p6, %p1783_p2 }
  0x2b   : > { %p1779_p1 = pneg %p1778_p10 }
  0x2d   : > { %p1786_p8 = pnand %p1785_p4, %p1779_p1 }
  0x2f   : > { %1789 = shalt.err (!%p1786_p8)
}
  0x30   : > { %s2401_s20 = smov 128   ;;  %s2403_s26 = smov 8  }
  0x31   : > { %1709 = dma.hbm_to_vmem [thread:$0]  (!%p2020_p11), %s2416_s2, 6144, %s2013_s7, [#allocation6], %s2401_s20, %s2401_s20, %s2403_s26  }
  0x32   : > { %p31_p1 = scmp.eq.s32.totalorder %s30_s11, 0  ;;  %p40_p2 = scmp.ne.s32.totalorder %s1920_s23, %s1916_s22 }
  0x33   : > { %p41_p4 = scmp.eq.s32.totalorder %s1924_s24, 0  ;;  %p1722_p6 = scmp.lt.s32.totalorder %s1924_s24, 2 }
  0x34   : > { %s2059_s13 = scalar_select %p31_p1, %s1920_s23, %s33_s10  }
  0x35   : > { %p42_p8 = por %p41_p4, %p40_p2  ;;  %p2418_p10 = scmp.eq.s32.totalorder %s1990_s25, 1 }
  0x36   : > { %2417 = sst [smem:[#allocation15_spill]] %s2059_s13  ;;  %s232_s8 = sand.u32 1, %s1920_s23  }
  0x37   : > { %p2063_p12 = por %p2418_p10, %p40_p2  ;;  %s1373_s15 = sshll.u32 %s1924_s24, 11 }
  0x38   : > { %s2069_s16 = sshll.u32 %s232_s8, 7  ;;  %s2420_s0 = sld [smem:[#allocation16_spill]] }
  0x39   : > { %s236_s10 = scalar_lea.vmem [#allocation2], %s2069_s16  ;;  %p2077_p11 = pnand %p1722_p6, %p42_p8 }
  0x3a   : > { %s243_s11 = sshll.u32 %s236_s10, 4  ;;  %s2086_s17 = scalar_lea.hbm %s2392_s1, %s1373_s15  ;;  %s2081_s11 = int_to_ptr.vmem [resolvable:$true] %s243_s11 }
  0x3b   : > { %s2088_s18 = scalar_lea.sflag [#allocation3], %s232_s8  ;;  %p1792_p0 = pneg %p2077_p11 }
  0x3e   : > { %s2074_s7 = scalar_lea.hbm %s2420_s0, %s1373_s15  ;;  %s1795_s2 = scalar_lea.hbm %s2420_s0, 4096 }
  0x3f   : > { %s1790_s20 = scalar_lea.hbm %s2074_s7, 2048  ;;  %p1796_p7 = scmp.lt.u32.totalorder %s2074_s7, %s2420_s0 }
  0x40   : > { %p1791_p13 = scmp.ne.s32.totalorder %s2074_s7, %s1790_s20  ;;  %p1797_p9 = scmp.lt.u32.totalorder %s1795_s2, %s1790_s20 }
  0x41   : > { %p1799_p2 = scmp.lt.u32.totalorder %s1790_s20, %s2074_s7 }
  0x42   : > { %p1793_p3 = pnand %p1792_p0, %p1791_p13  ;;  %p1798_p1 = por %p1797_p9, %p1796_p7 }
  0x44   : > { %p1794_p5 = pneg %p1793_p3  ;;  %p1800_p4 = por %p1799_p2, %p1798_p1 }
  0x46   : > { %p1801_p6 = pnand %p1800_p4, %p1794_p5 }
  0x48   : > { %1804 = shalt.err (!%p1801_p6)
}
  0x49   : > { %s1805_s8 = scalar_lea.vmem %s2081_s11, 2048  ;;  %s1929_s26 = smov [#allocation2]  }
  0x4a   : > { %p1806_p8 = scmp.ne.s32.totalorder %s2081_s11, %s1805_s8  ;;  %s1810_s15 = sshll.u32 %s1929_s26, 4  ;;  %s1811_s15 = int_to_ptr.vmem [resolvable:$false] %s1810_s15 }
  0x4b   : > { %s1812_s23 = scalar_lea.vmem %s1811_s15, 4096  ;;  %p1813_p3 = scmp.lt.s32.totalorder %s2081_s11, %s1811_s15 }
  0x4c   : > { %p1808_p10 = pnand %p1806_p8, %p1792_p0  ;;  %p1814_p7 = scmp.lt.s32.totalorder %s1812_s23, %s1805_s8 }
  0x4e   : > { %p1809_p13 = pneg %p1808_p10  ;;  %p1815_p9 = por %p1814_p7, %p1813_p3 }
  0x50   : > { %p1816_p1 = pnand %p1815_p9, %p1809_p13 }
  0x52   : > { %1819 = shalt.err (!%p1816_p1)
}
  0x53   : > { %s2422_s2 = smov 8   ;;  %s2423_s20 = smov 128  }
  0x54   : > { %1713 = dma.hbm_to_vmem [thread:$0]  (!%p2077_p11), %s2074_s7, 2048, %s2081_s11, %s2088_s18, %s2423_s20, %s2423_s20, %s2422_s2  }
  0x55   : > { %s257_s13 = scalar_lea.vmem [#allocation5], %s2069_s16  ;;  %s253_s12 = sand.u32 1, %s1924_s24  }
  0x56   : > { %s264_s30 = sshll.u32 %s257_s13, 4  ;;  %s2123_s10 = scalar_lea.sflag [#allocation6], %s253_s12  ;;  %s2121_s30 = int_to_ptr.vmem [resolvable:$true] %s264_s30 }
  0x57   : > { %s1820_s8 = scalar_lea.hbm %s2086_s17, 2048  ;;  %s1825_s23 = scalar_lea.hbm %s2392_s1, 4096 }
  0x58   : > { %p1821_p5 = scmp.ne.s32.totalorder %s2086_s17, %s1820_s8  ;;  %p1826_p6 = scmp.lt.u32.totalorder %s2086_s17, %s2392_s1 }
  0x59   : > { %p1827_p8 = scmp.lt.u32.totalorder %s1825_s23, %s1820_s8  ;;  %p1829_p13 = scmp.lt.u32.totalorder %s1820_s8, %s2086_s17 }
  0x5a   : > { %p1823_p2 = pnand %p1821_p5, %p1792_p0 }
  0x5b   : > { %p1828_p10 = por %p1827_p8, %p1826_p6 }
  0x5c   : > { %p1824_p4 = pneg %p1823_p2 }
  0x5d   : > { %p1830_p3 = por %p1829_p13, %p1828_p10 }
  0x5f   : > { %p1831_p7 = pnand %p1830_p3, %p1824_p4 }
  0x61   : > { %1834 = shalt.err (!%p1831_p7)
}
  0x62   : > { %s1835_s16 = scalar_lea.vmem %s2121_s30, 2048  ;;  %s1930_s7 = smov [#allocation5]  }
  0x63   : > { %p1836_p9 = scmp.ne.s32.totalorder %s2121_s30, %s1835_s16  ;;  %s1840_s11 = sshll.u32 %s1930_s7, 4  ;;  %s1841_s11 = int_to_ptr.vmem [resolvable:$false] %s1840_s11 }
  0x64   : > { %s1842_s0 = scalar_lea.vmem %s1841_s11, 4096  ;;  %p1843_p2 = scmp.lt.s32.totalorder %s2121_s30, %s1841_s11 }
  0x65   : > { %p1838_p1 = pnand %p1836_p9, %p1792_p0  ;;  %p1844_p6 = scmp.lt.s32.totalorder %s1842_s0, %s1835_s16 }
  0x67   : > { %p1839_p5 = pneg %p1838_p1  ;;  %p1845_p8 = por %p1844_p6, %p1843_p2 }
  0x69   : > { %p1846_p10 = pnand %p1845_p8, %p1839_p5 }
  0x6b   : > { %1849 = shalt.err (!%p1846_p10)
}
  0x6c   : > { %1716 = dma.hbm_to_vmem [thread:$0]  (!%p2077_p11), %s2086_s17, 2048, %s2121_s30, %s2123_s10, %s2423_s20, %s2423_s20, %s2422_s2  }
  0x6d   : > { %p2424_p0 = scmp.ne.s32.totalorder %s2413_s29, 0 }
  0x6e   : > { %s2155_s9 = sand.u32 (!%p2424_p0), 1, %s1916_s22   ;;  %p2425_p4 = scmp.ne.s32.totalorder (!%p2424_p0), %s2411_s27, 0 }
  0x6f   : > { %276 = sbr.rel (%p2424_p0) target bundleno = 1149 (0x47d), region = 36  ;;  %s2158_s18 = sshll.u32 (!%p2424_p0), %s2155_s9, 7 }
  0x70   : > { %s279_s19 = scalar_lea.sflag (!%p2424_p0), [#allocation3], %s2155_s9  ;;  %s2162_s13 = scalar_lea.vmem (!%p2424_p0), [#allocation2], %s2158_s18 }
  0x76   : > { %1895 = dma.done.wait (%p2425_p4), %s279_s19, 2048  }
  0x77   : > { %1897 = vsyncadd (%p2425_p4), %s279_s19, 4294965248  ;;  %s287_s29 = sand.u32 1, %s1990_s25   ;;  %s2170_s2 = scalar_lea.vmem [#allocation5], %s2158_s18 }
  0x78   : > { %s288_s17 = scalar_lea.sflag [#allocation6], %s287_s29 }
  0x79   : > { %1899 = dma.done.wait (%p2425_p4), %s288_s17, 2048  }
  0x7a   : > { %1901 = vsyncadd (%p2425_p4), %s288_s17, 4294965248  ;;  %p2426_p11 = scmp.eq.s32.totalorder %s1990_s25, 0 }
  0x7c   : > { %1903 = dma.done.wait (%p2426_p11), [#allocation6], 6144   ;;  %p2427_p13 = pmov %p2426_p11 }
  0x7d   : > { %v366_v0 = vld [vmem:[%s2170_s2] sm:$0xff]  ;;  %v367_v1 = vld [vmem:[%s2170_s2 + $0x8] sm:$0xff]  ;;  %v368_v2 = vld [vmem:[%s2170_s2 + $0x10] sm:$0xff]  ;;  %s2300_s30 = scalar_lea.vmem [#allocation8], %s2158_s18  ;;  %s1375_s12 = sshll.u32 %s1990_s25, 11 }
  0x7e   : > { %1905 = vsyncadd (%p2427_p13), [#allocation6], 4294961152  ;;  %v382_v3 = vpack.c.bf16 %v367_v1, %v366_v0  ;;  %v369_v4 = vld [vmem:[%s2170_s2 + $0x18] sm:$0xff]  ;;  %v370_v6 = vld [vmem:[%s2170_s2 + $0x20] sm:$0xff]  ;;  %s1203_s10 = sshll.u32 %s2300_s30, 4  ;;  %s2333_s15 = scalar_lea.hbm %s2395_s4, %s1375_s12  ;;  %s2335_s10 = int_to_ptr.vmem [resolvable:$true] %s1203_s10 }
  0x7f   : > { %v383_v5 = vpack.c.bf16 %v369_v4, %v368_v2  ;;  %v371_v7 = vld [vmem:[%s2170_s2 + $0x28] sm:$0xff]  ;;  %v342_v9 = vld [vmem:[%s2162_s13] sm:$0xff]  ;;  %v372_v11 = vld [vmem:[%s2170_s2 + $0x30] sm:$0xff]  ;;  %s1184_s23 = scalar_lea.sflag [#allocation4], %s2155_s9  ;;  %s1850_s16 = scalar_lea.vmem %s2335_s10, 2048 }
  0x80   : > { %1472 = vmatprep.subr.bf16.mxu1 %v382_v3  ;;  %v384_v8 = vpack.c.bf16 %v371_v7, %v370_v6  ;;  %v343_v10 = vld [vmem:[%s2162_s13 + $0x8] sm:$0xff]  ;;  %v373_v12 = vld [vmem:[%s2170_s2 + $0x38] sm:$0xff]  ;;  %v374_v15 = vld [vmem:[%s2170_s2 + $0x40] sm:$0xff]  ;;  %p1851_p3 = scmp.ne.s32.totalorder %s2335_s10, %s1850_s16  ;;  %s1931_s7 = smov [#allocation8]  }
  0x81   : > { %1473 = vmatpush3.bf16.msra.mxu1 %v382_v3  ;;  %v2190_v13 = vpack.c.bf16 %v343_v10, %v342_v9  ;;  %v385_v14 = vpack.c.bf16 %v373_v12, %v372_v11  ;;  %v375_v16 = vld [vmem:[%s2170_s2 + $0x48] sm:$0xff]  ;;  %v376_v18 = vld [vmem:[%s2170_s2 + $0x50] sm:$0xff]  ;;  %v377_v19 = vld [vmem:[%s2170_s2 + $0x58] sm:$0xff]  ;;  %s1854_s11 = sshll.u32 %s1931_s7, 4  ;;  %s1855_s11 = int_to_ptr.vmem [resolvable:$false] %s1854_s11 }
  0x82   : > { %1474 = vmatprep.subr.bf16.mxu1 %v383_v5  ;;  %v386_v17 = vpack.c.bf16 %v375_v16, %v374_v15  ;;  %v387_v20 = vpack.c.bf16 %v377_v19, %v376_v18  ;;  %v378_v21 = vld [vmem:[%s2170_s2 + $0x60] sm:$0xff]  ;;  %v379_v22 = vld [vmem:[%s2170_s2 + $0x68] sm:$0xff]  ;;  %v380_v24 = vld [vmem:[%s2170_s2 + $0x70] sm:$0xff]  ;;  %p1852_p7 = pnand %p1851_p3, %p2063_p12  ;;  %s1856_s0 = scalar_lea.vmem %s1855_s11, 4096 }
  0x83   : > { %1488 = vmatprep.mubr.bf16.mxu1 %v2190_v13  ;;  %v388_v23 = vpack.c.bf16 %v379_v22, %v378_v21  ;;  %v381_v25 = vld [vmem:[%s2170_s2 + $0x78] sm:$0xff]  ;;  %v344_v27 = vld [vmem:[%s2162_s13 + $0x10] sm:$0xff]  ;;  %v346_v29 = vld [vmem:[%s2162_s13 + $0x20] sm:$0xff]  ;;  %p1857_p1 = scmp.lt.s32.totalorder %s2335_s10, %s1855_s11  ;;  %p1858_p5 = scmp.lt.s32.totalorder %s1856_s0, %s1850_s16 }
  0x84   : > { %v389_v26 = vpack.c.bf16 %v381_v25, %v380_v24  ;;  %v345_v28 = vld [vmem:[%s2162_s13 + $0x18] sm:$0xff]  ;;  %v347_v30 = vld [vmem:[%s2162_s13 + $0x28] sm:$0xff]  ;;  %v348_v33 = vld [vmem:[%s2162_s13 + $0x30] sm:$0xff]  ;;  %p1853_p9 = pneg %p1852_p7 }
  0x85   : > { %1475 = vmatpush3.bf16.msra.mxu1 %v383_v5  ;;  %v2205_v31 = vpack.c.bf16 %v345_v28, %v344_v27  ;;  %v2207_v32 = vpack.c.bf16 %v347_v30, %v346_v29  ;;  %v349_v34 = vld [vmem:[%s2162_s13 + $0x38] sm:$0xff]  ;;  %v350_v35 = vld [vmem:[%s2162_s13 + $0x40] sm:$0xff]  ;;  %v351_v36 = vld [vmem:[%s2162_s13 + $0x48] sm:$0xff]  ;;  %p1859_p2 = por %p1858_p5, %p1857_p1 }
  0x86   : > { %1476 = vmatprep.subr.bf16.mxu1 %v384_v8  ;;  %v2215_v37 = vpack.c.bf16 %v349_v34, %v348_v33  ;;  %v2217_v38 = vpack.c.bf16 %v351_v36, %v350_v35  ;;  %v352_v39 = vld [vmem:[%s2162_s13 + $0x50] sm:$0xff]  ;;  %v353_v40 = vld [vmem:[%s2162_s13 + $0x58] sm:$0xff]  ;;  %v354_v41 = vld [vmem:[%s2162_s13 + $0x60] sm:$0xff] }
  0x87   : > { %v355_v42 = vld [vmem:[%s2162_s13 + $0x68] sm:$0xff]  ;;  %v2225_v43 = vpack.c.bf16 %v353_v40, %v352_v39  ;;  %v356_v45 = vld [vmem:[%s2162_s13 + $0x70] sm:$0xff]  ;;  %v357_v46 = vld [vmem:[%s2162_s13 + $0x78] sm:$0xff]  ;;  %p1860_p6 = pnand %p1859_p2, %p1853_p9 }
  0x88   : > { %v2227_v44 = vpack.c.bf16 %v355_v42, %v354_v41  ;;  %v2233_v47 = vpack.c.bf16 %v357_v46, %v356_v45  ;;  %v406_v48 = vld [vmem:[#allocation7 + $0x80] sm:$0xff]  ;;  %v407_v49 = vld [vmem:[#allocation7 + $0x88] sm:$0xff]  ;;  %v408_v50 = vld [vmem:[#allocation7 + $0x90] sm:$0xff] }
  0x89   : > { %1477 = vmatpush3.bf16.msra.mxu1 %v384_v8  ;;  %v446_v51 = vpack.c.bf16 %v407_v49, %v406_v48  ;;  %v409_v52 = vld [vmem:[#allocation7 + $0x98] sm:$0xff]  ;;  %v410_v54 = vld [vmem:[#allocation7 + $0xa0] sm:$0xff]  ;;  %v411_v55 = vld [vmem:[#allocation7 + $0xa8] sm:$0xff] }
  0x8a   : > { %1478 = vmatprep.subr.bf16.mxu1 %v385_v14  ;;  %v447_v53 = vpack.c.bf16 %v409_v52, %v408_v50  ;;  %v448_v56 = vpack.c.bf16 %v411_v55, %v410_v54  ;;  %v412_v57 = vld [vmem:[#allocation7 + $0xb0] sm:$0xff]  ;;  %v413_v58 = vld [vmem:[#allocation7 + $0xb8] sm:$0xff]  ;;  %v414_v60 = vld [vmem:[#allocation7 + $0xc0] sm:$0xff] }
  0x8b   : > { %1536 = vmatprep.subr.bf16.mxu0 %v446_v51  ;;  %v449_v59 = vpack.c.bf16 %v413_v58, %v412_v57  ;;  %v415_v61 = vld [vmem:[#allocation7 + $0xc8] sm:$0xff]  ;;  %v416_v63 = vld [vmem:[#allocation7 + $0xd0] sm:$0xff]  ;;  %v417_v0 = vld [vmem:[#allocation7 + $0xd8] sm:$0xff] }
  0x8c   : > { %1537 = vmatpush3.bf16.msra.mxu0 %v446_v51  ;;  %v450_v62 = vpack.c.bf16 %v415_v61, %v414_v60  ;;  %v451_v1 = vpack.c.bf16 %v417_v0, %v416_v63  ;;  %v418_v2 = vld [vmem:[#allocation7 + $0xe0] sm:$0xff]  ;;  %v419_v3 = vld [vmem:[#allocation7 + $0xe8] sm:$0xff]  ;;  %v420_v30 = vld [vmem:[#allocation7 + $0xf0] sm:$0xff] }
  0x8d   : > { %1479 = vmatpush3.bf16.msra.mxu1 %v385_v14  ;;  %1538 = vmatprep.subr.bf16.mxu0 %v447_v53  ;;  %v452_v4 = vpack.c.bf16 %v419_v3, %v418_v2  ;;  %v421_v33 = vld [vmem:[#allocation7 + $0xf8] sm:$0xff]  ;;  %v390_v35 = vld [vmem:[#allocation7] sm:$0xff]  ;;  %v391_v36 = vld [vmem:[#allocation7 + $0x8] sm:$0xff] }
  0x8e   : > { %1480 = vmatprep.subr.bf16.mxu1 %v386_v17  ;;  %v453_v34 = vpack.c.bf16 %v421_v33, %v420_v30  ;;  %v438_v39 = vpack.c.bf16 %v391_v36, %v390_v35  ;;  %v392_v45 = vld [vmem:[#allocation7 + $0x10] sm:$0xff]  ;;  %v393_v46 = vld [vmem:[#allocation7 + $0x18] sm:$0xff]  ;;  %v395_v52 = vld [vmem:[#allocation7 + $0x28] sm:$0xff] }
  0x8f   : > { %v439_v51 = vpack.c.bf16 %v393_v46, %v392_v45  ;;  %v396_v57 = vld [vmem:[#allocation7 + $0x30] sm:$0xff]  ;;  %v397_v58 = vld [vmem:[#allocation7 + $0x38] sm:$0xff]  ;;  %v398_v63 = vld [vmem:[#allocation7 + $0x40] sm:$0xff] }
  0x90   : > { %1539 = vmatpush3.bf16.msra.mxu0 %v447_v53  ;;  %v399_v0 = vld [vmem:[#allocation7 + $0x48] sm:$0xff]  ;;  %v428_v46 = vld [vmem:[#allocation7 + $0x130] sm:$0xff] }
  0x91   : > { %1481 = vmatpush3.bf16.msra.mxu1 %v386_v17  ;;  %1540 = vmatprep.subr.bf16.mxu0 %v448_v56  ;;  %v442_v3 = vpack.c.bf16 %v399_v0, %v398_v63  ;;  %v423_v35 = vld [vmem:[#allocation7 + $0x108] sm:$0xff] }
  0x92   : > { %1482 = vmatprep.subr.bf16.mxu1 %v387_v20  ;;  %v427_v45 = vld [vmem:[#allocation7 + $0x128] sm:$0xff] }
  0x94   : > { %1541 = vmatpush3.bf16.msra.mxu0 %v448_v56 }
  0x95   : > { %1483 = vmatpush3.bf16.msra.mxu1 %v387_v20  ;;  %1542 = vmatprep.subr.bf16.mxu0 %v449_v59 }
  0x96   : > { %1484 = vmatprep.subr.bf16.mxu1 %v388_v23 }
  0x98   : > { %1543 = vmatpush3.bf16.msra.mxu0 %v449_v59 }
  0x99   : > { %1485 = vmatpush3.bf16.msra.mxu1 %v388_v23  ;;  %1544 = vmatprep.subr.bf16.mxu0 %v450_v62 }
  0x9a   : > { %1486 = vmatprep.subr.bf16.mxu1 %v389_v26 }
  0x9c   : > { %1545 = vmatpush3.bf16.msra.mxu0 %v450_v62  ;;  %v441_v62 = vpack.c.bf16 %v397_v58, %v396_v57 }
  0x9d   : > { %1487 = vmatpush3.bf16.msra.mxu1 %v389_v26  ;;  %1546 = vmatprep.subr.bf16.mxu0 %v451_v1 }
  0xa0   : > { %1489 = vmatmul.mubr.bf16.vlgmr.msra.gmra.mrb[0].mxu1 %v2205_v31  ;;  %1547 = vmatpush3.bf16.msra.mxu0 %v451_v1 }
  0xa1   : > { %1492 = vmatprep.mubr.bf16.mxu1 %v2207_v32  ;;  %1548 = vmatprep.subr.bf16.mxu0 %v452_v4 }
  0xa4   : > { %1549 = vmatpush3.bf16.msra.mxu0 %v452_v4 }
  0xa5   : > { %1550 = vmatprep.subr.bf16.mxu0 %v453_v34 }
  0xa8   : > { %1493 = vmatmul.mubr.bf16.gmra.mrb[4].mxu1 %v2215_v37  ;;  %1551 = vmatpush3.bf16.msra.mxu0 %v453_v34  ;;  %v422_v34 = vld [vmem:[#allocation7 + $0x100] sm:$0xff] }
  0xa9   : > { %1496 = vmatprep.mubr.bf16.mxu1 %v2217_v38  ;;  %1568 = vmatprep.subr.bf16.mxu0 %v438_v39  ;;  %v454_v36 = vpack.c.bf16 %v423_v35, %v422_v34 }
  0xb0   : > { %1497 = vmatmul.mubr.bf16.gmra.mrb[8].mxu1 %v2225_v43 }
  0xb1   : > { %1500 = vmatprep.mubr.bf16.mxu1 %v2227_v44 }
  0xb8   : > { %1501 = vmatmul.mubr.bf16.gmra.mrb[12].mxu1 %v2233_v47 }
  0xb9   : > { %1520 = vmatprep.mubr.bf16.mxu1 %v2190_v13 }
 0x173   : > { %v1490_v5 = vpop.f32.mrb[0].mxu1 }
 0x174   : > { %v496_v6 = vpop.f32.mrb[1].mxu1 }
 0x175   : > { %v1491_v7 = vpop.f32.mrb[2].mxu1 }
 0x176   : > { %v2237_v8 = vpack.c.bf16 %v1491_v7, %v1490_v5  ;;  %v499_v9 = vpop.f32.mrb[3].mxu1  ;;  %v400_v5 = vld [vmem:[#allocation7 + $0x50] sm:$0xff] }
 0x177   : > { %v2239_v10 = vpack.c.bf16 %v499_v9, %v496_v6  ;;  %v401_v6 = vld [vmem:[#allocation7 + $0x58] sm:$0xff] }
 0x179   : > { %1504 = vmatprep.subr.bf16.mxu1 %v2239_v10 }
 0x17a   : > { %1505 = vmatpush3.bf16.msra.mxu1 %v2239_v10 }
 0x17b   : > { %v1494_v11 = vpop.f32.mrb[4].mxu1  ;;  %1506 = vmatprep.subr.bf16.mxu1 %v2237_v8 }
 0x17c   : > { %v512_v12 = vpop.f32.mrb[5].mxu1 }
 0x17d   : > { %v1495_v14 = vpop.f32.mrb[6].mxu1 }
 0x17e   : > { %v2244_v15 = vpack.c.bf16 %v1495_v14, %v1494_v11  ;;  %v515_v16 = vpop.f32.mrb[7].mxu1  ;;  %1507 = vmatpush3.bf16.msra.mxu1 %v2237_v8  ;;  %v402_v14 = vld [vmem:[#allocation7 + $0x60] sm:$0xff] }
 0x17f   : > { %v2247_v17 = vpack.c.bf16 %v515_v16, %v512_v12  ;;  %v443_v12 = vpack.c.bf16 %v401_v6, %v400_v5  ;;  %v403_v16 = vld [vmem:[#allocation7 + $0x68] sm:$0xff] }
 0x181   : > { %1508 = vmatprep.subr.bf16.mxu1 %v2247_v17 }
 0x182   : > { %1509 = vmatpush3.bf16.msra.mxu1 %v2247_v17 }
 0x183   : > { %v1498_v18 = vpop.f32.mrb[8].mxu1  ;;  %1510 = vmatprep.subr.bf16.mxu1 %v2244_v15 }
 0x184   : > { %v528_v19 = vpop.f32.mrb[9].mxu1 }
 0x185   : > { %v1499_v20 = vpop.f32.mrb[10].mxu1 }
 0x186   : > { %v2252_v21 = vpack.c.bf16 %v1499_v20, %v1498_v18  ;;  %v531_v22 = vpop.f32.mrb[11].mxu1  ;;  %1511 = vmatpush3.bf16.msra.mxu1 %v2244_v15  ;;  %v444_v20 = vpack.c.bf16 %v403_v16, %v402_v14 }
 0x187   : > { %v2255_v23 = vpack.c.bf16 %v531_v22, %v528_v19 }
 0x189   : > { %1512 = vmatprep.subr.bf16.mxu1 %v2255_v23 }
 0x18a   : > { %1513 = vmatpush3.bf16.msra.mxu1 %v2255_v23 }
 0x18b   : > { %v1502_v24 = vpop.f32.mrb[12].mxu1  ;;  %1514 = vmatprep.subr.bf16.mxu1 %v2252_v21 }
 0x18c   : > { %v544_v25 = vpop.f32.mrb[13].mxu1 }
 0x18d   : > { %v1503_v26 = vpop.f32.mrb[14].mxu1 }
 0x18e   : > { %v2260_v27 = vpack.c.bf16 %v1503_v26, %v1502_v24  ;;  %v547_v28 = vpop.f32.mrb[15].mxu1  ;;  %1515 = vmatpush3.bf16.msra.mxu1 %v2252_v21  ;;  %v404_v24 = vld [vmem:[#allocation7 + $0x70] sm:$0xff] }
 0x18f   : > { %v2263_v29 = vpack.c.bf16 %v547_v28, %v544_v25  ;;  %v405_v25 = vld [vmem:[#allocation7 + $0x78] sm:$0xff] }
 0x190   : > { %v445_v33 = vpack.c.bf16 %v405_v25, %v404_v24 }
 0x191   : > { %1516 = vmatprep.subr.bf16.mxu1 %v2263_v29 }
 0x192   : > { %1517 = vmatpush3.bf16.msra.mxu1 %v2263_v29 }
 0x193   : > { %1518 = vmatprep.subr.bf16.mxu1 %v2260_v27 }
 0x196   : > { %1519 = vmatpush3.bf16.msra.mxu1 %v2260_v27 }
 0x199   : > { %1521 = vmatmul.mubr.bf16.vlgmr.msra.gmra.mrb[16].mxu1 %v2205_v31 }
 0x19a   : > { %1524 = vmatprep.mubr.bf16.mxu1 %v2207_v32 }
 0x1a1   : > { %1525 = vmatmul.mubr.bf16.gmra.mrb[20].mxu1 %v2215_v37 }
 0x1a2   : > { %1528 = vmatprep.mubr.bf16.mxu1 %v2217_v38 }
 0x1a9   : > { %1529 = vmatmul.mubr.bf16.gmra.mrb[24].mxu1 %v2225_v43 }
 0x1aa   : > { %1532 = vmatprep.mubr.bf16.mxu1 %v2227_v44 }
 0x1b1   : > { %1533 = vmatmul.mubr.bf16.gmra.mrb[28].mxu1 %v2233_v47 }
 0x1b2   : > { %1616 = vmatprep.mubr.bf16.mxu1 %v2190_v13  ;;  %v394_v13 = vld [vmem:[#allocation7 + $0x20] sm:$0xff] }
 0x1b3   : > { %v440_v55 = vpack.c.bf16 %v395_v52, %v394_v13  ;;  %v434_v13 = vld [vmem:[#allocation7 + $0x160] sm:$0xff] }
 0x26c   : > { %v1522_v40 = vpop.f32.mrb[16].mxu1 }
 0x26d   : > { %v601_v41 = vpop.f32.mrb[17].mxu1 }
 0x26e   : > { %v1523_v42 = vpop.f32.mrb[18].mxu1 }
 0x26f   : > { %v665_v48 = vpack.c.bf16 %v1523_v42, %v1522_v40  ;;  %v604_v49 = vpop.f32.mrb[19].mxu1  ;;  %v425_v40 = vld [vmem:[#allocation7 + $0x118] sm:$0xff]  ;;  %v426_v42 = vld [vmem:[#allocation7 + $0x120] sm:$0xff] }
 0x270   : > { %v664_v50 = vpack.c.bf16 %v604_v49, %v601_v41 }
 0x272   : > { %1552 = vmatprep.mubr.bf16.mxu0 %v664_v50  ;;  %1600 = vmatprep.subr.bf16.mxu1 %v664_v50 }
 0x273   : > { %1553 = vmatmul.mubr.bf16.vlgmr.msra.gmra.mrb[0].mxu0 %v665_v48  ;;  %1601 = vmatpush3.bf16.msra.mxu1 %v664_v50  ;;  %v430_v50 = vld [vmem:[#allocation7 + $0x140] sm:$0xff] }
 0x274   : > { %v1526_v53 = vpop.f32.mrb[20].mxu1  ;;  %1569 = vmatpush3.bf16.msra.mxu0 %v438_v39  ;;  %1602 = vmatprep.subr.bf16.mxu1 %v665_v48  ;;  %v424_v39 = vld [vmem:[#allocation7 + $0x110] sm:$0xff] }
 0x275   : > { %v617_v54 = vpop.f32.mrb[21].mxu1  ;;  %1570 = vmatprep.subr.bf16.mxu0 %v439_v51  ;;  %v455_v41 = vpack.c.bf16 %v425_v40, %v424_v39 }
 0x276   : > { %v1527_v56 = vpop.f32.mrb[22].mxu1 }
 0x277   : > { %v667_v59 = vpack.c.bf16 %v1527_v56, %v1526_v53  ;;  %v620_v60 = vpop.f32.mrb[23].mxu1  ;;  %1603 = vmatpush3.bf16.msra.mxu1 %v665_v48  ;;  %v429_v48 = vld [vmem:[#allocation7 + $0x138] sm:$0xff] }
 0x278   : > { %v666_v61 = vpack.c.bf16 %v620_v60, %v617_v54  ;;  %1571 = vmatpush3.bf16.msra.mxu0 %v439_v51  ;;  %v457_v49 = vpack.c.bf16 %v429_v48, %v428_v46 }
 0x279   : > { %1572 = vmatprep.subr.bf16.mxu0 %v440_v55 }
 0x27a   : > { %1556 = vmatprep.mubr.bf16.mxu0 %v666_v61  ;;  %1604 = vmatprep.subr.bf16.mxu1 %v666_v61 }
 0x27b   : > { %1557 = vmatmul.mubr.bf16.gmra.mrb[4].mxu0 %v667_v59  ;;  %1605 = vmatpush3.bf16.msra.mxu1 %v666_v61 }
 0x27c   : > { %v1530_v1 = vpop.f32.mrb[24].mxu1  ;;  %1573 = vmatpush3.bf16.msra.mxu0 %v440_v55  ;;  %1606 = vmatprep.subr.bf16.mxu1 %v667_v59 }
 0x27d   : > { %v633_v2 = vpop.f32.mrb[25].mxu1  ;;  %1574 = vmatprep.subr.bf16.mxu0 %v441_v62 }
 0x27e   : > { %v1531_v4 = vpop.f32.mrb[26].mxu1 }
 0x27f   : > { %v669_v7 = vpack.c.bf16 %v1531_v4, %v1530_v1  ;;  %v636_v9 = vpop.f32.mrb[27].mxu1  ;;  %1607 = vmatpush3.bf16.msra.mxu1 %v667_v59 }
 0x280   : > { %v668_v11 = vpack.c.bf16 %v636_v9, %v633_v2  ;;  %1575 = vmatpush3.bf16.msra.mxu0 %v441_v62 }
 0x281   : > { %1576 = vmatprep.subr.bf16.mxu0 %v442_v3 }
 0x282   : > { %1560 = vmatprep.mubr.bf16.mxu0 %v668_v11  ;;  %1608 = vmatprep.subr.bf16.mxu1 %v668_v11 }
 0x283   : > { %1561 = vmatmul.mubr.bf16.gmra.mrb[8].mxu0 %v669_v7  ;;  %1609 = vmatpush3.bf16.msra.mxu1 %v668_v11 }
 0x284   : > { %v1534_v18 = vpop.f32.mrb[28].mxu1  ;;  %1577 = vmatpush3.bf16.msra.mxu0 %v442_v3  ;;  %1610 = vmatprep.subr.bf16.mxu1 %v669_v7 }
 0x285   : > { %v649_v19 = vpop.f32.mrb[29].mxu1  ;;  %1578 = vmatprep.subr.bf16.mxu0 %v443_v12 }
 0x286   : > { %v1535_v22 = vpop.f32.mrb[30].mxu1 }
 0x287   : > { %v671_v26 = vpack.c.bf16 %v1535_v22, %v1534_v18  ;;  %v652_v28 = vpop.f32.mrb[31].mxu1  ;;  %1611 = vmatpush3.bf16.msra.mxu1 %v669_v7  ;;  %v2295_v7 = vld [vmem:[%s2394_s3] ss:$0 sm:$0xff] }
 0x288   : > { %v670_v30 = vpack.c.bf16 %v652_v28, %v649_v19  ;;  %1579 = vmatpush3.bf16.msra.mxu0 %v443_v12 }
 0x289   : > { %1580 = vmatprep.subr.bf16.mxu0 %v444_v20 }
 0x28a   : > { %1564 = vmatprep.mubr.bf16.mxu0 %v670_v30  ;;  %1612 = vmatprep.subr.bf16.mxu1 %v670_v30 }
 0x28b   : > { %1565 = vmatmul.mubr.bf16.gmra.mrb[12].mxu0 %v671_v26  ;;  %1613 = vmatpush3.bf16.msra.mxu1 %v670_v30 }
 0x28c   : > { %1581 = vmatpush3.bf16.msra.mxu0 %v444_v20  ;;  %1584 = vmatprep.mubr.bf16.mxu0 %v2239_v10  ;;  %v456_v10 = vpack.c.bf16 %v427_v45, %v426_v42 }
 0x28d   : > { %1614 = vmatprep.subr.bf16.mxu1 %v671_v26  ;;  %1582 = vmatprep.subr.bf16.mxu0 %v445_v33 }
 0x28f   : > { %1615 = vmatpush3.bf16.msra.mxu1 %v671_v26 }
 0x290   : > { %1583 = vmatpush3.bf16.msra.mxu0 %v445_v33 }
 0x291   : > { %1632 = vmatprep.subr.bf16.mxu0 %v454_v36 }
 0x292   : > { %1617 = vmatmul.mubr.bf16.vlgmr.msra.gmra.mrb[32].mxu1 %v2205_v31  ;;  %v431_v31 = vld [vmem:[#allocation7 + $0x148] sm:$0xff] }
 0x293   : > { %1585 = vmatmul.mubr.bf16.vlgmr.msra.gmra.mrb[0].mxu0 %v2237_v8  ;;  %1620 = vmatprep.mubr.bf16.mxu1 %v2207_v32  ;;  %v458_v32 = vpack.c.bf16 %v431_v31, %v430_v50  ;;  %v432_v8 = vld [vmem:[#allocation7 + $0x150] sm:$0xff] }
 0x294   : > { %1588 = vmatprep.mubr.bf16.mxu0 %v2247_v17  ;;  %1633 = vmatpush3.bf16.msra.mxu0 %v454_v36  ;;  %v433_v17 = vld [vmem:[#allocation7 + $0x158] sm:$0xff] }
 0x295   : > { %1634 = vmatprep.subr.bf16.mxu0 %v455_v41  ;;  %v459_v51 = vpack.c.bf16 %v433_v17, %v432_v8 }
 0x298   : > { %1635 = vmatpush3.bf16.msra.mxu0 %v455_v41 }
 0x299   : > { %1636 = vmatprep.subr.bf16.mxu0 %v456_v10 }
 0x29a   : > { %1621 = vmatmul.mubr.bf16.gmra.mrb[36].mxu1 %v2215_v37  ;;  %v435_v37 = vld [vmem:[#allocation7 + $0x168] sm:$0xff] }
 0x29b   : > { %1589 = vmatmul.mubr.bf16.gmra.mrb[4].mxu0 %v2244_v15  ;;  %1624 = vmatprep.mubr.bf16.mxu1 %v2217_v38  ;;  %v460_v38 = vpack.c.bf16 %v435_v37, %v434_v13  ;;  %v436_v15 = vld [vmem:[#allocation7 + $0x170] sm:$0xff] }
 0x29c   : > { %1592 = vmatprep.mubr.bf16.mxu0 %v2255_v23  ;;  %1637 = vmatpush3.bf16.msra.mxu0 %v456_v10 }
 0x29d   : > { %1638 = vmatprep.subr.bf16.mxu0 %v457_v49 }
 0x2a0   : > { %1639 = vmatpush3.bf16.msra.mxu0 %v457_v49 }
 0x2a1   : > { %1640 = vmatprep.subr.bf16.mxu0 %v458_v32 }
 0x2a2   : > { %1625 = vmatmul.mubr.bf16.gmra.mrb[40].mxu1 %v2225_v43  ;;  %v437_v43 = vld [vmem:[#allocation7 + $0x178] sm:$0xff] }
 0x2a3   : > { %1593 = vmatmul.mubr.bf16.gmra.mrb[8].mxu0 %v2252_v21  ;;  %1628 = vmatprep.mubr.bf16.mxu1 %v2227_v44  ;;  %v461_v23 = vpack.c.bf16 %v437_v43, %v436_v15 }
 0x2a4   : > { %1596 = vmatprep.mubr.bf16.mxu0 %v2263_v29  ;;  %1641 = vmatpush3.bf16.msra.mxu0 %v458_v32 }
 0x2a5   : > { %1642 = vmatprep.subr.bf16.mxu0 %v459_v51 }
 0x2a8   : > { %1643 = vmatpush3.bf16.msra.mxu0 %v459_v51 }
 0x2a9   : > { %1644 = vmatprep.subr.bf16.mxu0 %v460_v38 }
 0x2aa   : > { %1629 = vmatmul.mubr.bf16.gmra.mrb[44].mxu1 %v2233_v47 }
 0x2ab   : > { %1597 = vmatmul.mubr.bf16.gmra.mrb[12].mxu0 %v2260_v27 }
 0x2ac   : > { %1645 = vmatpush3.bf16.msra.mxu0 %v460_v38 }
 0x2ad   : > { %1646 = vmatprep.subr.bf16.mxu0 %v461_v23 }
 0x2b0   : > { %1647 = vmatpush3.bf16.msra.mxu0 %v461_v23 }
 0x365   : > { %v1618_v21 = vpop.f32.mrb[32].mxu1 }
 0x366   : > { %v900_v52 = vpop.f32.mrb[33].mxu1 }
 0x367   : > { %v1619_v44 = vpop.f32.mrb[34].mxu1 }
 0x368   : > { %v964_v53 = vpack.c.bf16 %v1619_v44, %v1618_v21  ;;  %v903_v29 = vpop.f32.mrb[35].mxu1 }
 0x369   : > { %v963_v54 = vpack.c.bf16 %v903_v29, %v900_v52 }
 0x36b   : > { %1648 = vmatprep.mubr.bf16.mxu0 %v963_v54 }
 0x36c   : > { %1649 = vmatmul.mubr.bf16.vlgmr.msra.gmra.mrb[0].mxu0 %v964_v53 }
 0x36d   : > { %v1622_v55 = vpop.f32.mrb[36].mxu1 }
 0x36e   : > { %v916_v56 = vpop.f32.mrb[37].mxu1 }
 0x36f   : > { %v1623_v57 = vpop.f32.mrb[38].mxu1 }
 0x370   : > { %v966_v47 = vpack.c.bf16 %v1623_v57, %v1622_v55  ;;  %v919_v58 = vpop.f32.mrb[39].mxu1 }
 0x371   : > { %v965_v27 = vpack.c.bf16 %v919_v58, %v916_v56 }
 0x373   : > { %1652 = vmatprep.mubr.bf16.mxu0 %v965_v27 }
 0x374   : > { %1653 = vmatmul.mubr.bf16.gmra.mrb[4].mxu0 %v966_v47 }
 0x375   : > { %v1626_v59 = vpop.f32.mrb[40].mxu1 }
 0x376   : > { %v932_v60 = vpop.f32.mrb[41].mxu1 }
 0x377   : > { %v1627_v61 = vpop.f32.mrb[42].mxu1 }
 0x378   : > { %v968_v62 = vpack.c.bf16 %v1627_v61, %v1626_v59  ;;  %v935_v63 = vpop.f32.mrb[43].mxu1 }
 0x379   : > { %v967_v0 = vpack.c.bf16 %v935_v63, %v932_v60 }
 0x37b   : > { %1656 = vmatprep.mubr.bf16.mxu0 %v967_v0 }
 0x37c   : > { %1657 = vmatmul.mubr.bf16.gmra.mrb[8].mxu0 %v968_v62 }
 0x37d   : > { %v1630_v1 = vpop.f32.mrb[44].mxu1 }
 0x37e   : > { %v948_v2 = vpop.f32.mrb[45].mxu1 }
 0x37f   : > { %v1631_v3 = vpop.f32.mrb[46].mxu1 }
 0x380   : > { %v970_v4 = vpack.c.bf16 %v1631_v3, %v1630_v1  ;;  %v951_v5 = vpop.f32.mrb[47].mxu1 }
 0x381   : > { %v969_v6 = vpack.c.bf16 %v951_v5, %v948_v2 }
 0x383   : > { %1660 = vmatprep.mubr.bf16.mxu0 %v969_v6 }
 0x384   : > { %1661 = vmatmul.mubr.bf16.gmra.mrb[12].mxu0 %v970_v4 }
 0x43f   : > { %v1650_v9 = vpop.f32.mrb[0].mxu0 }
 0x440   : > { %v1093_v11 = vadd.f32 %v1650_v9, %v2295_v7  ;;  %v1005_v12 = vpop.f32.mrb[1].mxu0 }
 0x441   : > { %v1091_v14 = vadd.f32 %v2295_v7, %v1005_v12  ;;  %v1651_v16 = vpop.f32.mrb[2].mxu0 }
 0x442   : > { %1109 = vst [vmem:[%s2300_s30 + $0x10] sm:$0xff] %v1093_v11  ;;  %v1094_v18 = vadd.f32 %v1651_v16, %v2295_v7  ;;  %v1008_v19 = vpop.f32.mrb[3].mxu0  ;;  %v1147_v26 = vmul.f32 %v1093_v11, %v1093_v11 }
 0x443   : > { %1107 = vst [vmem:[%s2300_s30] sm:$0xff] %v1091_v14  ;;  %v1092_v20 = vadd.f32 %v2295_v7, %v1008_v19  ;;  %v1145_v22 = vmul.f32 %v1091_v14, %v1091_v14 }
 0x444   : > { %1110 = vst [vmem:[%s2300_s30 + $0x18] sm:$0xff] %v1094_v18  ;;  %v1148_v36 = vmul.f32 %v1094_v18, %v1094_v18 }
 0x445   : > { %1108 = vst [vmem:[%s2300_s30 + $0x8] sm:$0xff] %v1092_v20  ;;  %v1123_v24 = vadd.f32 %v1092_v20, %v1091_v14  ;;  %v1146_v25 = vmul.f32 %v1092_v20, %v1092_v20 }
 0x447   : > { %v1124_v28 = vadd.f32 %v1123_v24, %v1093_v11  ;;  %v1161_v30 = vadd.f32 %v1146_v25, %v1145_v22  ;;  %v1654_v33 = vpop.f32.mrb[4].mxu0 }
 0x448   : > { %v1097_v34 = vadd.f32 %v1654_v33, %v2295_v7  ;;  %v1021_v35 = vpop.f32.mrb[5].mxu0 }
 0x449   : > { %v1162_v39 = vadd.f32 %v1161_v30, %v1147_v26  ;;  %v1095_v40 = vadd.f32 %v2295_v7, %v1021_v35  ;;  %v1125_v41 = vadd.f32 %v1124_v28, %v1094_v18  ;;  %v1655_v42 = vpop.f32.mrb[6].mxu0 }
 0x44a   : > { %1113 = vst [vmem:[%s2300_s30 + $0x30] sm:$0xff] %v1097_v34  ;;  %v1098_v45 = vadd.f32 %v1655_v42, %v2295_v7  ;;  %v1024_v10 = vpop.f32.mrb[7].mxu0  ;;  %v1151_v17 = vmul.f32 %v1097_v34, %v1097_v34 }
 0x44b   : > { %1111 = vst [vmem:[%s2300_s30 + $0x20] sm:$0xff] %v1095_v40  ;;  %v1126_v46 = vadd.f32 %v1125_v41, %v1095_v40  ;;  %v1149_v48 = vmul.f32 %v1095_v40, %v1095_v40  ;;  %v1163_v49 = vadd.f32 %v1162_v39, %v1148_v36  ;;  %v1096_v50 = vadd.f32 %v2295_v7, %v1024_v10 }
 0x44c   : > { %1114 = vst [vmem:[%s2300_s30 + $0x38] sm:$0xff] %v1098_v45  ;;  %v1152_v43 = vmul.f32 %v1098_v45, %v1098_v45 }
 0x44d   : > { %v1164_v31 = vadd.f32 %v1163_v49, %v1149_v48  ;;  %1112 = vst [vmem:[%s2300_s30 + $0x28] sm:$0xff] %v1096_v50  ;;  %v1127_v32 = vadd.f32 %v1126_v46, %v1096_v50  ;;  %v1150_v8 = vmul.f32 %v1096_v50, %v1096_v50 }
 0x44f   : > { %v1128_v51 = vadd.f32 %v1127_v32, %v1097_v34  ;;  %v1165_v13 = vadd.f32 %v1164_v31, %v1150_v8  ;;  %v1658_v37 = vpop.f32.mrb[8].mxu0 }
 0x450   : > { %v1101_v38 = vadd.f32 %v1658_v37, %v2295_v7  ;;  %v1037_v15 = vpop.f32.mrb[9].mxu0 }
 0x451   : > { %v1166_v23 = vadd.f32 %v1165_v13, %v1151_v17  ;;  %v1099_v21 = vadd.f32 %v2295_v7, %v1037_v15  ;;  %v1129_v52 = vadd.f32 %v1128_v51, %v1098_v45  ;;  %v1659_v44 = vpop.f32.mrb[10].mxu0 }
 0x452   : > { %1117 = vst [vmem:[%s2300_s30 + $0x50] sm:$0xff] %v1101_v38  ;;  %v1102_v53 = vadd.f32 %v1659_v44, %v2295_v7  ;;  %v1040_v29 = vpop.f32.mrb[11].mxu0  ;;  %v1155_v59 = vmul.f32 %v1101_v38, %v1101_v38 }
 0x453   : > { %1115 = vst [vmem:[%s2300_s30 + $0x40] sm:$0xff] %v1099_v21  ;;  %v1130_v54 = vadd.f32 %v1129_v52, %v1099_v21  ;;  %v1153_v55 = vmul.f32 %v1099_v21, %v1099_v21  ;;  %v1167_v56 = vadd.f32 %v1166_v23, %v1152_v43  ;;  %v1100_v57 = vadd.f32 %v2295_v7, %v1040_v29 }
 0x454   : > { %1118 = vst [vmem:[%s2300_s30 + $0x58] sm:$0xff] %v1102_v53  ;;  %v1156_v1 = vmul.f32 %v1102_v53, %v1102_v53 }
 0x455   : > { %v1168_v47 = vadd.f32 %v1167_v56, %v1153_v55  ;;  %1116 = vst [vmem:[%s2300_s30 + $0x48] sm:$0xff] %v1100_v57  ;;  %v1131_v58 = vadd.f32 %v1130_v54, %v1100_v57  ;;  %v1154_v27 = vmul.f32 %v1100_v57, %v1100_v57 }
 0x457   : > { %v1132_v60 = vadd.f32 %v1131_v58, %v1101_v38  ;;  %v1169_v61 = vadd.f32 %v1168_v47, %v1154_v27  ;;  %v1662_v62 = vpop.f32.mrb[12].mxu0 }
 0x458   : > { %v1105_v63 = vadd.f32 %v1662_v62, %v2295_v7  ;;  %v1053_v0 = vpop.f32.mrb[13].mxu0 }
 0x459   : > { %v1170_v2 = vadd.f32 %v1169_v61, %v1155_v59  ;;  %v1103_v3 = vadd.f32 %v2295_v7, %v1053_v0  ;;  %v1133_v4 = vadd.f32 %v1132_v60, %v1102_v53  ;;  %v1663_v5 = vpop.f32.mrb[14].mxu0 }
 0x45a   : > { %1121 = vst [vmem:[%s2300_s30 + $0x70] sm:$0xff] %v1105_v63  ;;  %v1106_v6 = vadd.f32 %v1663_v5, %v2295_v7  ;;  %v1056_v9 = vpop.f32.mrb[15].mxu0 }
 0x45b   : > { %1119 = vst [vmem:[%s2300_s30 + $0x60] sm:$0xff] %v1103_v3  ;;  %v1134_v11 = vadd.f32 %v1133_v4, %v1103_v3  ;;  %v1157_v12 = vmul.f32 %v1103_v3, %v1103_v3  ;;  %v1171_v14 = vadd.f32 %v1170_v2, %v1156_v1  ;;  %v1104_v16 = vadd.f32 %v2295_v7, %v1056_v9 }
 0x45c   : > { %1122 = vst [vmem:[%s2300_s30 + $0x78] sm:$0xff] %v1106_v6 }
 0x45d   : > { %v1172_v18 = vadd.f32 %v1171_v14, %v1157_v12  ;;  %1120 = vst [vmem:[%s2300_s30 + $0x68] sm:$0xff] %v1104_v16  ;;  %v1135_v19 = vadd.f32 %v1134_v11, %v1104_v16  ;;  %v1158_v20 = vmul.f32 %v1104_v16, %v1104_v16 }
 0x45e   : > { %1863 = shalt.err (!%p1860_p6)
}
 0x45f   : > { %s1864_s18 = scalar_lea.hbm %s2333_s15, 2048  ;;  %s1868_s29 = scalar_lea.hbm %s2395_s4, 4096 }
 0x460   : > { %p1865_p8 = scmp.ne.s32.totalorder %s2333_s15, %s1864_s18  ;;  %p1869_p4 = scmp.lt.u32.totalorder %s2333_s15, %s2395_s4 }
 0x461   : > { %p1870_p11 = scmp.lt.u32.totalorder %s1868_s29, %s1864_s18  ;;  %p1872_p3 = scmp.lt.u32.totalorder %s1864_s18, %s2333_s15 }
 0x462   : > { %p1866_p10 = pnand %p1865_p8, %p2063_p12 }
 0x463   : > { %p1871_p13 = por %p1870_p11, %p1869_p4 }
 0x464   : > { %p1867_p0 = pneg %p1866_p10 }
 0x465   : > { %p1873_p7 = por %p1872_p3, %p1871_p13 }
 0x467   : > { %p1874_p9 = pnand %p1873_p7, %p1867_p0 }
 0x469   : > { %1877 = shalt.err (!%p1874_p9)
}
 0x46a   : > { %s1932_s27 = smov 128   ;;  %s1933_s20 = smov 8   ;;  %v1159_v7 = vmul.f32 %v1105_v63, %v1105_v63  ;;  %v1136_v22 = vadd.f32 %v1135_v19, %v1105_v63  ;;  %v1173_v24 = vadd.f32 %v1172_v18, %v1158_v20  ;;  %v1160_v25 = vmul.f32 %v1106_v6, %v1106_v6 }
 0x46b   : > { %1704 = dma.vmem_to_hbm [thread:$0]  (%p2063_p12), %s2335_s10, 2048, %s2333_s15, %s1184_s23, %s1932_s27, %s1932_s27, %s1933_s20  }
 0x46c   : > { %v1137_v26 = vadd.f32 %v1136_v22, %v1106_v6  ;;  %v1174_v28 = vadd.f32 %v1173_v24, %v1159_v7  ;;  %p335_p1 = scmp.lt.s32.totalorder %s1990_s25, 1 }
 0x46e   : > { %v1138_v30 = vrot.slane %v1137_v26, 4  ;;  %v1175_v33 = vadd.f32 %v1174_v28, %v1160_v25  ;;  %s2437_s25 = smov (!%p335_p1, %s1990_s25), 1 }
 0x46f   : > { %s337_s30 = scalar_lea.vmem %s2396_s5, %s2437_s25  ;;  %s340_s8 = scalar_lea.vmem %s2397_s6, %s2437_s25 }
 0x470   : > { %v1139_v34 = vadd.f32 %v1138_v30, %v1137_v26  ;;  %v1176_v35 = vrot.slane %v1175_v33, 4 }
 0x472   : > { %v1140_v36 = vrot.slane %v1139_v34, 2  ;;  %v1177_v39 = vadd.f32 %v1176_v35, %v1175_v33 }
 0x474   : > { %v1141_v40 = vadd.f32 %v1140_v36, %v1139_v34  ;;  %v1178_v41 = vrot.slane %v1177_v39, 2 }
 0x476   : > { %v1142_v42 = vrot.slane %v1141_v40, 1  ;;  %v1179_v45 = vadd.f32 %v1178_v41, %v1177_v39 }
 0x478   : > { %v1143_v10 = vadd.f32 %v1142_v42, %v1141_v40  ;;  %v1180_v46 = vrot.slane %v1179_v45, 1 }
 0x47a   : > { %1144 = vst [vmem:[%s337_s30] sm:$0x1] %v1143_v10  ;;  %v1181_v48 = vadd.f32 %v1180_v46, %v1179_v45 }
 0x47c   : > { %1182 = vst [vmem:[%s340_s8] sm:$0x1] %v1181_v48 }
 0x47d PF: > { %s1224_s26 = sand.u32 1, %s1912_s21   ;;  %p2428_p12 = scmp.ne.s32.totalorder %s2412_s28, 0 }
 0x47e   : > { %p2429_p5 = scmp.ge.s32.totalorder %s1924_s24, 2  ;;  %s1225_s15 = scalar_lea.sflag [#allocation4], %s1224_s26 }
 0x480   : > { %p1718_p2 = pnand %p2429_p5, %p2428_p12 }
 0x482   : > { %1907 = dma.done.wait (!%p1718_p2), %s1225_s15, 2048  }
 0x483   : > { %1909 = vsyncadd (!%p1718_p2), %s1225_s15, 4294965248  ;;  %s2430_s24 = sld [smem:[#allocation14_spill]]  ;;  %s2431_s23 = sld [smem:[#allocation13_spill]] }
 0x484   : > { %s2432_s16 = sld [smem:[#allocation15_spill]]  ;;  %s2433_s21 = smov %s1916_s22 }
 0x489   : > { %p23_p6 = scmp.ge.s32.totalorder %s2430_s24, 4   ;;  %s2434_s22 = smov %s2431_s23 }
 0x48a   : > { %s2435_s23 = smov %s2432_s16 }
 0x48b   :  { %25 = sbr.rel (!%p23_p6) target bundleno = 10 (0xa), region = 122 }
 0x492   :  { %1242 = vsyncpa [#allocation3], 1 }
 0x493   :  { %1244 = vsyncpa [#allocation3 + $0x1], 1 }
 0x494   :  { %1245 = vsyncpa [#allocation6], 1 }
 0x495   :  { %1247 = vsyncpa [#allocation6 + $0x1], 1 }
 0x496   :  { %1248 = vsyncpa [#allocation4], 1 }
 0x497   :  { %1250 = vsyncpa [#allocation4 + $0x1], 1 }

</bundles_post_ra>
